<compile_context>
chip_gen: v6e
topology: v6e:2x2x1
jax: 0.10.0
libtpu: 0.0.40
codegen_flags: <defaults>
</compile_context>

<pallas_src>
import jax
import jax.numpy as jnp
from jax.experimental import pallas as pl
from jax.experimental.pallas import tpu as pltpu

LN_EPS = 1e-5
VMEM_BUDGET_BYTES = 40 * 1024 * 1024   # conservative across v5e / v6e / v7x
VMEM_LIMIT_BYTES = 48 * 1024 * 1024    # scoped-VMEM limit passed to Mosaic


def _round_up(x: int, m: int) -> int:
    return ((x + m - 1) // m) * m


def _layernorm(h, gamma, beta):
    # One-pass stats: var = E[h^2] - E[h]^2 removes the serial mu -> var
    # dependency between two cross-lane reductions per layer.
    inv_n = 1.0 / h.shape[-1]
    mu = jnp.sum(h, axis=-1, keepdims=True) * inv_n
    ex2 = jnp.sum(h * h, axis=-1, keepdims=True) * inv_n
    var = jnp.maximum(ex2 - mu * mu, 0.0)
    return (h - mu) * jax.lax.rsqrt(var + LN_EPS) * gamma + beta


def _mish(x):
    # mish(x) = x * tanh(softplus(x));  with u = 1 + e^x:
    #   tanh(log(u)) = (u^2 - 1) / (u^2 + 1)
    # -> one EUP exp (clamped so u^2 stays finite) + near-free approx
    #    reciprocal, instead of exp/log1p/tanh (~3 EUP transcendentals).
    e = jnp.exp(jnp.minimum(x, 20.0))
    u = 1.0 + e
    u2 = u * u
    t = (u2 - 1.0) * pl.reciprocal(u2 + 1.0, approx=True)
    return x * t


def actor_net_kernel(x_ref, w1_ref, w2_ref, w3_ref, vecs_ref, o_ref):
    L = w1_ref.shape[0]
    out_pad = w3_ref.shape[1]

    x = x_ref[...]                       # (TB, L) bf16 — fed straight to the MXU
    vecs = vecs_ref[...]                 # (8, P) f32 — single DMA for all vectors
    b1, g1, be1 = vecs[0:1, :L], vecs[1:2, :L], vecs[2:3, :L]
    b2, g2, be2 = vecs[3:4, :L], vecs[4:5, :L], vecs[5:6, :L]
    b3 = vecs[6:7, :out_pad]

    # --- NormedLinear 1: Linear (bf16 MXU, f32 acc) -> LayerNorm -> Mish ---
    h = jnp.dot(x, w1_ref[...], preferred_element_type=jnp.float32) + b1
    h = _mish(_layernorm(h, g1, be1))

    # --- NormedLinear 2 ---
    h = jnp.dot(h.astype(jnp.bfloat16), w2_ref[...],
                preferred_element_type=jnp.float32) + b2
    h = _mish(_layernorm(h, g2, be2))

    # --- Final Linear; columns zero-padded so the output store is lane-dense ---
    out = jnp.dot(h.astype(jnp.bfloat16), w3_ref[...],
                  preferred_element_type=jnp.float32) + b3
    o_ref[...] = out.astype(o_ref.dtype)


def _pick_batch_tile(B, L, out_pad, P, block_b, out_itemsize):
    """Batch tile: multiple of 16 (bf16 packing), >=2 grid steps when B allows
    (both v7x TensorCores busy), capped by a per-generation-safe VMEM budget."""
    if B <= 16:
        return B
    TB = max(16, min(block_b, _round_up(-(-B // 2), 16)))
    # Worst-case estimate: double-buffered x tile + output tile + weights
    # (double-buffered in the fallback path), as if everything is resident.
    weight_bytes = 2 * (2 * L * L * 2 + L * out_pad * 2 + 8 * P * 4)
    per_row = 2 * L * 2 + 2 * out_pad * out_itemsize
    tb_max = max(16, ((VMEM_BUDGET_BYTES - weight_bytes) // per_row) // 16 * 16)
    return max(16, min(TB, tb_max))


def actor_net_forward(latent_state, params, *, block_b=512, out_dtype=jnp.float32):
    """latent_state: (B, L).  Returns (B, 2*A) in out_dtype (default f32)."""
    B, L = latent_state.shape
    w1, w2, w3, vecs = params["w1"], params["w2"], params["w3"], params["vecs"]
    out_dim = params["out_dim"]
    out_pad = w3.shape[1]
    P = vecs.shape[1]

    # bf16 into the kernel: halves the activation HBM->VMEM DMA per tile.
    x = latent_state.astype(jnp.bfloat16)

    out_itemsize = jnp.finfo(out_dtype).bits // 8
    TB = _pick_batch_tile(B, L, out_pad, P, block_b, out_itemsize)
    grid = (pl.cdiv(B, TB),)             # ragged last block: masked store only

    def run(single_buffer_weights):
        # Constant-index operands gain nothing from double buffering.
        wkw = ({"pipeline_mode": pl.Buffered(buffer_count=1)}
               if single_buffer_weights else {})
        in_specs = [
            pl.BlockSpec((TB, L), lambda i: (i, 0)),              # activation tile
            pl.BlockSpec((L, L), lambda i: (0, 0), **wkw),        # w1 (resident)
            pl.BlockSpec((L, L), lambda i: (0, 0), **wkw),        # w2 (resident)
            pl.BlockSpec((L, out_pad), lambda i: (0, 0), **wkw),  # w3 (resident, lane-padded)
            pl.BlockSpec((8, P), lambda i: (0, 0), **wkw),        # packed b1,g1,be1,b2,g2,be2,b3
        ]
        return pl.pallas_call(
            actor_net_kernel,
            out_shape=jax.ShapeDtypeStruct((B, out_pad), out_dtype),
            grid=grid,
            in_specs=in_specs,
            out_specs=pl.BlockSpec((TB, out_pad), lambda i: (i, 0)),
            compiler_params=pltpu.CompilerParams(
                dimension_semantics=("parallel",),   # megacore on v7x
                vmem_limit_bytes=VMEM_LIMIT_BYTES),
        )(x, w1, w2, w3, vecs)

    try:
        out = jax.block_until_ready(run(True))
    except Exception:
        # pipeline_mode=pl.Buffered(1) not supported by this Pallas build:
        # fall back to default (double-buffered) weight BlockSpecs.
        out = run(False)

    return out[:, :out_dim]


def init_params(key, latent_size, action_size):
    """Deterministic synthetic parameters matching the PyTorch module shapes.

    nn.Linear stores weight as (out, in); we keep (in, out) so the kernel
    computes x @ W (identical math to x @ weight.T).  Weights are stored bf16
    for the MXU; the six LayerNorm/bias vectors and b3 are packed into a
    single (8, P) f32 array; w3/b3 columns are zero-padded to a lane-dense
    multiple of 128."""
    ks = jax.random.split(key, 6)
    L, A = latent_size, action_size
    out_dim = 2 * A
    out_pad = _round_up(out_dim, 128)
    P = max(L, out_pad)

    def lin(kw, kb, fan_in, fan_out):
        bound = 1.0 / (fan_in ** 0.5)
        w = jax.random.uniform(kw, (fan_in, fan_out), jnp.float32, -bound, bound)
        b = jax.random.uniform(kb, (fan_out,), jnp.float32, -bound, bound)
        return w, b

    w1, b1 = lin(ks[0], ks[1], L, L)
    w2, b2 = lin(ks[2], ks[3], L, L)
    w3, b3 = lin(ks[4], ks[5], L, out_dim)
    g1 = jnp.ones((L,), jnp.float32)
    be1 = jnp.zeros((L,), jnp.float32)
    g2 = jnp.ones((L,), jnp.float32)
    be2 = jnp.zeros((L,), jnp.float32)

    def pad_row(v):
        return jnp.zeros((P,), jnp.float32).at[: v.shape[0]].set(v)

    vecs = jnp.stack([pad_row(b1), pad_row(g1), pad_row(be1),
                      pad_row(b2), pad_row(g2), pad_row(be2),
                      pad_row(b3), jnp.zeros((P,), jnp.float32)])
    w3_pad = jnp.zeros((L, out_pad), jnp.float32).at[:, :out_dim].set(w3)

    return {
        "w1": w1.astype(jnp.bfloat16),
        "w2": w2.astype(jnp.bfloat16),
        "w3": w3_pad.astype(jnp.bfloat16),
        "vecs": vecs,
        "out_dim": out_dim,
        # f32 originals for the reference check
        "f32": {"w1": w1, "b1": b1, "g1": g1, "be1": be1,
                "w2": w2, "b2": b2, "g2": g2, "be2": be2,
                "w3": w3, "b3": b3},
    }


def _reference(latent_state, params):
    """Pure-JAX reference: PyTorch NormedLinear semantics with the same bf16
    matmul-input precision the kernel uses (standard softplus/tanh Mish and
    two-pass LayerNorm, exact division)."""
    f = params["f32"]

    def dot_bf16(a, w):
        return jnp.dot(a.astype(jnp.bfloat16), w.astype(jnp.bfloat16),
                       preferred_element_type=jnp.float32)

    def normed(x, w, b, g, be):
        h = dot_bf16(x, w) + b
        mu = h.mean(-1, keepdims=True)
        var = ((h - mu) ** 2).mean(-1, keepdims=True)
        h = (h - mu) / jnp.sqrt(var + LN_EPS) * g + be
        return h * jnp.tanh(jax.nn.softplus(h))

    h = normed(latent_state, f["w1"], f["b1"], f["g1"], f["be1"])
    h = normed(h, f["w2"], f["b2"], f["g2"], f["be2"])
    return dot_bf16(h, f["w3"]) + f["b3"]


if __name__ == "__main__":
    batch = 20            # not a multiple of the tile -> exercises ragged last block
    latent_size = 32
    action_size = 4

    key = jax.random.PRNGKey(0)
    k_x, k_p = jax.random.split(key)
    latent_state = jax.random.normal(k_x, (batch, latent_size), jnp.float32)
    params = init_params(k_p, latent_size, action_size)

    # Default tile policy gives TB=16 -> grid=(2,) here: exercises a multi-step
    # batch grid, the masked ragged final block, and megacore-friendly >=2 steps.
    out = actor_net_forward(latent_state, params)
    out = jax.block_until_ready(out)

    ref = _reference(latent_state, params)
    assert out.shape == (batch, 2 * action_size)
    assert jnp.allclose(out, ref, atol=2e-2, rtol=2e-2), "mismatch vs reference"

    print("KERNEL_OK")
</pallas_src>

<mosaic_0001>
module attributes {stable_mosaic.version = 11 : i64} {
  func.func @actor_net_kernel(%arg0: i32, %arg1: memref<16x32xbf16, #tpu.memory_space<vmem>>, %arg2: memref<32x32xbf16, #tpu.memory_space<vmem>>, %arg3: memref<32x32xbf16, #tpu.memory_space<vmem>>, %arg4: memref<32x128xbf16, #tpu.memory_space<vmem>>, %arg5: memref<8x128xf32, #tpu.memory_space<vmem>>, %arg6: memref<16x128xf32, #tpu.memory_space<vmem>>) attributes {dimension_semantics = [#tpu.dimension_semantics<parallel>], iteration_bounds = array<i64: 2>, scalar_prefetch = 0 : i64, scratch_operands = 0 : i64, tpu.core_type = #tpu.core_type<tc>, window_params = [{transform_indices = @transform_0, window_bounds = array<i64: 16, 32>}, {pipeline_mode = #tpu.pipeline_mode<synchronous>, transform_indices = @transform_1, window_bounds = array<i64: 32, 32>}, {pipeline_mode = #tpu.pipeline_mode<synchronous>, transform_indices = @transform_2, window_bounds = array<i64: 32, 32>}, {pipeline_mode = #tpu.pipeline_mode<synchronous>, transform_indices = @transform_3, window_bounds = array<i64: 32, 128>}, {pipeline_mode = #tpu.pipeline_mode<synchronous>, transform_indices = @transform_4, window_bounds = array<i64: 8, 128>}, {transform_indices = @transform_5, window_bounds = array<i64: 16, 128>}]} {
    %c0 = arith.constant 0 : index
    %c0_0 = arith.constant 0 : index
    %0 = vector.load %arg1[%c0, %c0_0] : memref<16x32xbf16, #tpu.memory_space<vmem>>, vector<16x32xbf16>
    %c0_1 = arith.constant 0 : index
    %c0_2 = arith.constant 0 : index
    %1 = vector.load %arg5[%c0_1, %c0_2] : memref<8x128xf32, #tpu.memory_space<vmem>>, vector<8x128xf32>
    %2 = vector.extract_strided_slice %1 {offsets = [0, 0], sizes = [1, 32], strides = [1, 1]} : vector<8x128xf32> to vector<1x32xf32>
    %3 = vector.extract_strided_slice %1 {offsets = [1, 0], sizes = [1, 32], strides = [1, 1]} : vector<8x128xf32> to vector<1x32xf32>
    %4 = vector.extract_strided_slice %1 {offsets = [2, 0], sizes = [1, 32], strides = [1, 1]} : vector<8x128xf32> to vector<1x32xf32>
    %5 = vector.extract_strided_slice %1 {offsets = [3, 0], sizes = [1, 32], strides = [1, 1]} : vector<8x128xf32> to vector<1x32xf32>
    %6 = vector.extract_strided_slice %1 {offsets = [4, 0], sizes = [1, 32], strides = [1, 1]} : vector<8x128xf32> to vector<1x32xf32>
    %7 = vector.extract_strided_slice %1 {offsets = [5, 0], sizes = [1, 32], strides = [1, 1]} : vector<8x128xf32> to vector<1x32xf32>
    %8 = vector.extract_strided_slice %1 {offsets = [6, 0], sizes = [1, 128], strides = [1, 1]} : vector<8x128xf32> to vector<1x128xf32>
    %c0_3 = arith.constant 0 : index
    %c0_4 = arith.constant 0 : index
    %9 = vector.load %arg2[%c0_3, %c0_4] : memref<32x32xbf16, #tpu.memory_space<vmem>>, vector<32x32xbf16>
    %cst = arith.constant dense<0.000000e+00> : vector<16x32xf32>
    %10 = tpu.matmul %0, %9, %cst {dimension_numbers = #tpu.dot_dimension_numbers<[1], [0], [0], [1], [0, 0, 1, 1], [], []>} : vector<16x32xbf16>, vector<32x32xbf16>, vector<16x32xf32> -> vector<16x32xf32>
    %11 = vector.broadcast %2 : vector<1x32xf32> to vector<16x32xf32>
    %12 = arith.addf %10, %11 : vector<16x32xf32>
    %cst_5 = arith.constant dense<0.000000e+00> : vector<16xf32>
    %13 = vector.multi_reduction <add>, %12, %cst_5 [1] : vector<16x32xf32> to vector<16xf32>
    %14 = vector.shape_cast %13 : vector<16xf32> to vector<16x1xf32>
    %cst_6 = arith.constant 3.125000e-02 : f32
    %15 = vector.broadcast %cst_6 : f32 to vector<16x1xf32>
    %16 = arith.mulf %14, %15 : vector<16x1xf32>
    %17 = arith.mulf %12, %12 : vector<16x32xf32>
    %cst_7 = arith.constant dense<0.000000e+00> : vector<16xf32>
    %18 = vector.multi_reduction <add>, %17, %cst_7 [1] : vector<16x32xf32> to vector<16xf32>
    %19 = vector.shape_cast %18 : vector<16xf32> to vector<16x1xf32>
    %cst_8 = arith.constant 3.125000e-02 : f32
    %20 = vector.broadcast %cst_8 : f32 to vector<16x1xf32>
    %21 = arith.mulf %19, %20 : vector<16x1xf32>
    %22 = arith.mulf %16, %16 : vector<16x1xf32>
    %23 = arith.subf %21, %22 : vector<16x1xf32>
    %cst_9 = arith.constant 0.000000e+00 : f32
    %24 = vector.broadcast %cst_9 : f32 to vector<16x1xf32>
    %25 = arith.maximumf %23, %24 : vector<16x1xf32>
    %26 = vector.broadcast %16 : vector<16x1xf32> to vector<16x32xf32>
    %27 = arith.subf %12, %26 : vector<16x32xf32>
    %cst_10 = arith.constant 9.99999974E-6 : f32
    %28 = vector.broadcast %cst_10 : f32 to vector<16x1xf32>
    %29 = arith.addf %25, %28 : vector<16x1xf32>
    %30 = math.rsqrt %29 : vector<16x1xf32>
    %31 = vector.broadcast %30 : vector<16x1xf32> to vector<16x32xf32>
    %32 = arith.mulf %27, %31 : vector<16x32xf32>
    %33 = vector.broadcast %3 : vector<1x32xf32> to vector<16x32xf32>
    %34 = arith.mulf %32, %33 : vector<16x32xf32>
    %35 = vector.broadcast %4 : vector<1x32xf32> to vector<16x32xf32>
    %36 = arith.addf %34, %35 : vector<16x32xf32>
    %cst_11 = arith.constant 2.000000e+01 : f32
    %37 = vector.broadcast %cst_11 : f32 to vector<16x32xf32>
    %38 = arith.minimumf %36, %37 : vector<16x32xf32>
    %39 = math.exp %38 : vector<16x32xf32>
    %cst_12 = arith.constant 1.000000e+00 : f32
    %40 = vector.broadcast %cst_12 : f32 to vector<16x32xf32>
    %41 = arith.addf %40, %39 : vector<16x32xf32>
    %42 = arith.mulf %41, %41 : vector<16x32xf32>
    %cst_13 = arith.constant 1.000000e+00 : f32
    %43 = vector.broadcast %cst_13 : f32 to vector<16x32xf32>
    %44 = arith.subf %42, %43 : vector<16x32xf32>
    %cst_14 = arith.constant 1.000000e+00 : f32
    %45 = vector.broadcast %cst_14 : f32 to vector<16x32xf32>
    %46 = arith.addf %42, %45 : vector<16x32xf32>
    %47 = tpu.reciprocal %46 {approx = true} : vector<16x32xf32> -> vector<16x32xf32>
    %48 = arith.mulf %44, %47 : vector<16x32xf32>
    %49 = arith.mulf %36, %48 : vector<16x32xf32>
    %50 = arith.truncf %49 : vector<16x32xf32> to vector<16x32xbf16>
    %c0_15 = arith.constant 0 : index
    %c0_16 = arith.constant 0 : index
    %51 = vector.load %arg3[%c0_15, %c0_16] : memref<32x32xbf16, #tpu.memory_space<vmem>>, vector<32x32xbf16>
    %cst_17 = arith.constant dense<0.000000e+00> : vector<16x32xf32>
    %52 = tpu.matmul %50, %51, %cst_17 {dimension_numbers = #tpu.dot_dimension_numbers<[1], [0], [0], [1], [0, 0, 1, 1], [], []>} : vector<16x32xbf16>, vector<32x32xbf16>, vector<16x32xf32> -> vector<16x32xf32>
    %53 = vector.broadcast %5 : vector<1x32xf32> to vector<16x32xf32>
    %54 = arith.addf %52, %53 : vector<16x32xf32>
    %cst_18 = arith.constant dense<0.000000e+00> : vector<16xf32>
    %55 = vector.multi_reduction <add>, %54, %cst_18 [1] : vector<16x32xf32> to vector<16xf32>
    %56 = vector.shape_cast %55 : vector<16xf32> to vector<16x1xf32>
    %cst_19 = arith.constant 3.125000e-02 : f32
    %57 = vector.broadcast %cst_19 : f32 to vector<16x1xf32>
    %58 = arith.mulf %56, %57 : vector<16x1xf32>
    %59 = arith.mulf %54, %54 : vector<16x32xf32>
    %cst_20 = arith.constant dense<0.000000e+00> : vector<16xf32>
    %60 = vector.multi_reduction <add>, %59, %cst_20 [1] : vector<16x32xf32> to vector<16xf32>
    %61 = vector.shape_cast %60 : vector<16xf32> to vector<16x1xf32>
    %cst_21 = arith.constant 3.125000e-02 : f32
    %62 = vector.broadcast %cst_21 : f32 to vector<16x1xf32>
    %63 = arith.mulf %61, %62 : vector<16x1xf32>
    %64 = arith.mulf %58, %58 : vector<16x1xf32>
    %65 = arith.subf %63, %64 : vector<16x1xf32>
    %cst_22 = arith.constant 0.000000e+00 : f32
    %66 = vector.broadcast %cst_22 : f32 to vector<16x1xf32>
    %67 = arith.maximumf %65, %66 : vector<16x1xf32>
    %68 = vector.broadcast %58 : vector<16x1xf32> to vector<16x32xf32>
    %69 = arith.subf %54, %68 : vector<16x32xf32>
    %cst_23 = arith.constant 9.99999974E-6 : f32
    %70 = vector.broadcast %cst_23 : f32 to vector<16x1xf32>
    %71 = arith.addf %67, %70 : vector<16x1xf32>
    %72 = math.rsqrt %71 : vector<16x1xf32>
    %73 = vector.broadcast %72 : vector<16x1xf32> to vector<16x32xf32>
    %74 = arith.mulf %69, %73 : vector<16x32xf32>
    %75 = vector.broadcast %6 : vector<1x32xf32> to vector<16x32xf32>
    %76 = arith.mulf %74, %75 : vector<16x32xf32>
    %77 = vector.broadcast %7 : vector<1x32xf32> to vector<16x32xf32>
    %78 = arith.addf %76, %77 : vector<16x32xf32>
    %cst_24 = arith.constant 2.000000e+01 : f32
    %79 = vector.broadcast %cst_24 : f32 to vector<16x32xf32>
    %80 = arith.minimumf %78, %79 : vector<16x32xf32>
    %81 = math.exp %80 : vector<16x32xf32>
    %cst_25 = arith.constant 1.000000e+00 : f32
    %82 = vector.broadcast %cst_25 : f32 to vector<16x32xf32>
    %83 = arith.addf %82, %81 : vector<16x32xf32>
    %84 = arith.mulf %83, %83 : vector<16x32xf32>
    %cst_26 = arith.constant 1.000000e+00 : f32
    %85 = vector.broadcast %cst_26 : f32 to vector<16x32xf32>
    %86 = arith.subf %84, %85 : vector<16x32xf32>
    %cst_27 = arith.constant 1.000000e+00 : f32
    %87 = vector.broadcast %cst_27 : f32 to vector<16x32xf32>
    %88 = arith.addf %84, %87 : vector<16x32xf32>
    %89 = tpu.reciprocal %88 {approx = true} : vector<16x32xf32> -> vector<16x32xf32>
    %90 = arith.mulf %86, %89 : vector<16x32xf32>
    %91 = arith.mulf %78, %90 : vector<16x32xf32>
    %92 = arith.truncf %91 : vector<16x32xf32> to vector<16x32xbf16>
    %c0_28 = arith.constant 0 : index
    %c0_29 = arith.constant 0 : index
    %93 = vector.load %arg4[%c0_28, %c0_29] : memref<32x128xbf16, #tpu.memory_space<vmem>>, vector<32x128xbf16>
    %cst_30 = arith.constant dense<0.000000e+00> : vector<16x128xf32>
    %94 = tpu.matmul %92, %93, %cst_30 {dimension_numbers = #tpu.dot_dimension_numbers<[1], [0], [0], [1], [0, 0, 1, 1], [], []>} : vector<16x32xbf16>, vector<32x128xbf16>, vector<16x128xf32> -> vector<16x128xf32>
    %95 = vector.broadcast %8 : vector<1x128xf32> to vector<16x128xf32>
    %96 = arith.addf %94, %95 : vector<16x128xf32>
    %c0_31 = arith.constant 0 : index
    %c0_32 = arith.constant 0 : index
    %97 = vector.load %arg6[%c0_31, %c0_32] : memref<16x128xf32, #tpu.memory_space<vmem>>, vector<16x128xf32>
    tpu.vector_store %arg6[%c0_31, %c0_32], %96 {strides = array<i32>} : memref<16x128xf32, #tpu.memory_space<vmem>>, vector<16x128xf32>,
    return
  }
  func.func @transform_0(%arg0: i32) -> (i32, i32) {
    %c0_i32 = arith.constant 0 : i32
    %c0_i32_0 = arith.constant 0 : i32
    return %arg0, %c0_i32 : i32, i32
  }
  func.func @transform_1(%arg0: i32) -> (i32, i32) {
    %c0_i32 = arith.constant 0 : i32
    %c0_i32_0 = arith.constant 0 : i32
    %c0_i32_1 = arith.constant 0 : i32
    return %c0_i32, %c0_i32_0 : i32, i32
  }
  func.func @transform_2(%arg0: i32) -> (i32, i32) {
    %c0_i32 = arith.constant 0 : i32
    %c0_i32_0 = arith.constant 0 : i32
    %c0_i32_1 = arith.constant 0 : i32
    return %c0_i32, %c0_i32_0 : i32, i32
  }
  func.func @transform_3(%arg0: i32) -> (i32, i32) {
    %c0_i32 = arith.constant 0 : i32
    %c0_i32_0 = arith.constant 0 : i32
    %c0_i32_1 = arith.constant 0 : i32
    return %c0_i32, %c0_i32_0 : i32, i32
  }
  func.func @transform_4(%arg0: i32) -> (i32, i32) {
    %c0_i32 = arith.constant 0 : i32
    %c0_i32_0 = arith.constant 0 : i32
    %c0_i32_1 = arith.constant 0 : i32
    return %c0_i32, %c0_i32_0 : i32, i32
  }
  func.func @transform_5(%arg0: i32) -> (i32, i32) {
    %c0_i32 = arith.constant 0 : i32
    %c0_i32_0 = arith.constant 0 : i32
    return %arg0, %c0_i32 : i32, i32
  }
}

module attributes {stable_mosaic.version = 11 : i64} {
  func.func @actor_net_kernel(%arg0: i32, %arg1: memref<16x32xbf16, #tpu.memory_space<vmem>>, %arg2: memref<32x32xbf16, #tpu.memory_space<vmem>>, %arg3: memref<32x32xbf16, #tpu.memory_space<vmem>>, %arg4: memref<32x128xbf16, #tpu.memory_space<vmem>>, %arg5: memref<8x128xf32, #tpu.memory_space<vmem>>, %arg6: memref<16x128xf32, #tpu.memory_space<vmem>>) attributes {dimension_semantics = [#tpu.dimension_semantics<parallel>], iteration_bounds = array<i64: 2>, scalar_prefetch = 0 : i64, scratch_operands = 0 : i64, tpu.core_type = #tpu.core_type<tc>, window_params = [{transform_indices = @transform_0, window_bounds = array<i64: 16, 32>}, {pipeline_mode = #tpu.pipeline_mode<synchronous>, transform_indices = @transform_1, window_bounds = array<i64: 32, 32>}, {pipeline_mode = #tpu.pipeline_mode<synchronous>, transform_indices = @transform_2, window_bounds = array<i64: 32, 32>}, {pipeline_mode = #tpu.pipeline_mode<synchronous>, transform_indices = @transform_3, window_bounds = array<i64: 32, 128>}, {pipeline_mode = #tpu.pipeline_mode<synchronous>, transform_indices = @transform_4, window_bounds = array<i64: 8, 128>}, {transform_indices = @transform_5, window_bounds = array<i64: 16, 128>}]} {
    %c0 = arith.constant 0 : index
    %c0_0 = arith.constant 0 : index
    %0 = vector.load %arg1[%c0, %c0_0] : memref<16x32xbf16, #tpu.memory_space<vmem>>, vector<16x32xbf16>
    %c0_1 = arith.constant 0 : index
    %c0_2 = arith.constant 0 : index
    %1 = vector.load %arg5[%c0_1, %c0_2] : memref<8x128xf32, #tpu.memory_space<vmem>>, vector<8x128xf32>
    %2 = vector.extract_strided_slice %1 {offsets = [0, 0], sizes = [1, 32], strides = [1, 1]} : vector<8x128xf32> to vector<1x32xf32>
    %3 = vector.extract_strided_slice %1 {offsets = [1, 0], sizes = [1, 32], strides = [1, 1]} : vector<8x128xf32> to vector<1x32xf32>
    %4 = vector.extract_strided_slice %1 {offsets = [2, 0], sizes = [1, 32], strides = [1, 1]} : vector<8x128xf32> to vector<1x32xf32>
    %5 = vector.extract_strided_slice %1 {offsets = [3, 0], sizes = [1, 32], strides = [1, 1]} : vector<8x128xf32> to vector<1x32xf32>
    %6 = vector.extract_strided_slice %1 {offsets = [4, 0], sizes = [1, 32], strides = [1, 1]} : vector<8x128xf32> to vector<1x32xf32>
    %7 = vector.extract_strided_slice %1 {offsets = [5, 0], sizes = [1, 32], strides = [1, 1]} : vector<8x128xf32> to vector<1x32xf32>
    %8 = vector.extract_strided_slice %1 {offsets = [6, 0], sizes = [1, 128], strides = [1, 1]} : vector<8x128xf32> to vector<1x128xf32>
    %c0_3 = arith.constant 0 : index
    %c0_4 = arith.constant 0 : index
    %9 = vector.load %arg2[%c0_3, %c0_4] : memref<32x32xbf16, #tpu.memory_space<vmem>>, vector<32x32xbf16>
    %cst = arith.constant dense<0.000000e+00> : vector<16x32xf32>
    %10 = tpu.matmul %0, %9, %cst {dimension_numbers = #tpu.dot_dimension_numbers<[1], [0], [0], [1], [0, 0, 1, 1], [], []>} : vector<16x32xbf16>, vector<32x32xbf16>, vector<16x32xf32> -> vector<16x32xf32>
    %11 = vector.broadcast %2 : vector<1x32xf32> to vector<16x32xf32>
    %12 = arith.addf %10, %11 : vector<16x32xf32>
    %cst_5 = arith.constant dense<0.000000e+00> : vector<16xf32>
    %13 = vector.multi_reduction <add>, %12, %cst_5 [1] : vector<16x32xf32> to vector<16xf32>
    %14 = vector.shape_cast %13 : vector<16xf32> to vector<16x1xf32>
    %cst_6 = arith.constant 3.125000e-02 : f32
    %15 = vector.broadcast %cst_6 : f32 to vector<16x1xf32>
    %16 = arith.mulf %14, %15 : vector<16x1xf32>
    %17 = arith.mulf %12, %12 : vector<16x32xf32>
    %cst_7 = arith.constant dense<0.000000e+00> : vector<16xf32>
    %18 = vector.multi_reduction <add>, %17, %cst_7 [1] : vector<16x32xf32> to vector<16xf32>
    %19 = vector.shape_cast %18 : vector<16xf32> to vector<16x1xf32>
    %cst_8 = arith.constant 3.125000e-02 : f32
    %20 = vector.broadcast %cst_8 : f32 to vector<16x1xf32>
    %21 = arith.mulf %19, %20 : vector<16x1xf32>
    %22 = arith.mulf %16, %16 : vector<16x1xf32>
    %23 = arith.subf %21, %22 : vector<16x1xf32>
    %cst_9 = arith.constant 0.000000e+00 : f32
    %24 = vector.broadcast %cst_9 : f32 to vector<16x1xf32>
    %25 = arith.maximumf %23, %24 : vector<16x1xf32>
    %26 = vector.broadcast %16 : vector<16x1xf32> to vector<16x32xf32>
    %27 = arith.subf %12, %26 : vector<16x32xf32>
    %cst_10 = arith.constant 9.99999974E-6 : f32
    %28 = vector.broadcast %cst_10 : f32 to vector<16x1xf32>
    %29 = arith.addf %25, %28 : vector<16x1xf32>
    %30 = math.rsqrt %29 : vector<16x1xf32>
    %31 = vector.broadcast %30 : vector<16x1xf32> to vector<16x32xf32>
    %32 = arith.mulf %27, %31 : vector<16x32xf32>
    %33 = vector.broadcast %3 : vector<1x32xf32> to vector<16x32xf32>
    %34 = arith.mulf %32, %33 : vector<16x32xf32>
    %35 = vector.broadcast %4 : vector<1x32xf32> to vector<16x32xf32>
    %36 = arith.addf %34, %35 : vector<16x32xf32>
    %cst_11 = arith.constant 2.000000e+01 : f32
    %37 = vector.broadcast %cst_11 : f32 to vector<16x32xf32>
    %38 = arith.minimumf %36, %37 : vector<16x32xf32>
    %39 = math.exp %38 : vector<16x32xf32>
    %cst_12 = arith.constant 1.000000e+00 : f32
    %40 = vector.broadcast %cst_12 : f32 to vector<16x32xf32>
    %41 = arith.addf %40, %39 : vector<16x32xf32>
    %42 = arith.mulf %41, %41 : vector<16x32xf32>
    %cst_13 = arith.constant 1.000000e+00 : f32
    %43 = vector.broadcast %cst_13 : f32 to vector<16x32xf32>
    %44 = arith.subf %42, %43 : vector<16x32xf32>
    %cst_14 = arith.constant 1.000000e+00 : f32
    %45 = vector.broadcast %cst_14 : f32 to vector<16x32xf32>
    %46 = arith.addf %42, %45 : vector<16x32xf32>
    %47 = tpu.reciprocal %46 {approx = true} : vector<16x32xf32> -> vector<16x32xf32>
    %48 = arith.mulf %44, %47 : vector<16x32xf32>
    %49 = arith.mulf %36, %48 : vector<16x32xf32>
    %50 = arith.truncf %49 : vector<16x32xf32> to vector<16x32xbf16>
    %c0_15 = arith.constant 0 : index
    %c0_16 = arith.constant 0 : index
    %51 = vector.load %arg3[%c0_15, %c0_16] : memref<32x32xbf16, #tpu.memory_space<vmem>>, vector<32x32xbf16>
    %cst_17 = arith.constant dense<0.000000e+00> : vector<16x32xf32>
    %52 = tpu.matmul %50, %51, %cst_17 {dimension_numbers = #tpu.dot_dimension_numbers<[1], [0], [0], [1], [0, 0, 1, 1], [], []>} : vector<16x32xbf16>, vector<32x32xbf16>, vector<16x32xf32> -> vector<16x32xf32>
    %53 = vector.broadcast %5 : vector<1x32xf32> to vector<16x32xf32>
    %54 = arith.addf %52, %53 : vector<16x32xf32>
    %cst_18 = arith.constant dense<0.000000e+00> : vector<16xf32>
    %55 = vector.multi_reduction <add>, %54, %cst_18 [1] : vector<16x32xf32> to vector<16xf32>
    %56 = vector.shape_cast %55 : vector<16xf32> to vector<16x1xf32>
    %cst_19 = arith.constant 3.125000e-02 : f32
    %57 = vector.broadcast %cst_19 : f32 to vector<16x1xf32>
    %58 = arith.mulf %56, %57 : vector<16x1xf32>
    %59 = arith.mulf %54, %54 : vector<16x32xf32>
    %cst_20 = arith.constant dense<0.000000e+00> : vector<16xf32>
    %60 = vector.multi_reduction <add>, %59, %cst_20 [1] : vector<16x32xf32> to vector<16xf32>
    %61 = vector.shape_cast %60 : vector<16xf32> to vector<16x1xf32>
    %cst_21 = arith.constant 3.125000e-02 : f32
    %62 = vector.broadcast %cst_21 : f32 to vector<16x1xf32>
    %63 = arith.mulf %61, %62 : vector<16x1xf32>
    %64 = arith.mulf %58, %58 : vector<16x1xf32>
    %65 = arith.subf %63, %64 : vector<16x1xf32>
    %cst_22 = arith.constant 0.000000e+00 : f32
    %66 = vector.broadcast %cst_22 : f32 to vector<16x1xf32>
    %67 = arith.maximumf %65, %66 : vector<16x1xf32>
    %68 = vector.broadcast %58 : vector<16x1xf32> to vector<16x32xf32>
    %69 = arith.subf %54, %68 : vector<16x32xf32>
    %cst_23 = arith.constant 9.99999974E-6 : f32
    %70 = vector.broadcast %cst_23 : f32 to vector<16x1xf32>
    %71 = arith.addf %67, %70 : vector<16x1xf32>
    %72 = math.rsqrt %71 : vector<16x1xf32>
    %73 = vector.broadcast %72 : vector<16x1xf32> to vector<16x32xf32>
    %74 = arith.mulf %69, %73 : vector<16x32xf32>
    %75 = vector.broadcast %6 : vector<1x32xf32> to vector<16x32xf32>
    %76 = arith.mulf %74, %75 : vector<16x32xf32>
    %77 = vector.broadcast %7 : vector<1x32xf32> to vector<16x32xf32>
    %78 = arith.addf %76, %77 : vector<16x32xf32>
    %cst_24 = arith.constant 2.000000e+01 : f32
    %79 = vector.broadcast %cst_24 : f32 to vector<16x32xf32>
    %80 = arith.minimumf %78, %79 : vector<16x32xf32>
    %81 = math.exp %80 : vector<16x32xf32>
    %cst_25 = arith.constant 1.000000e+00 : f32
    %82 = vector.broadcast %cst_25 : f32 to vector<16x32xf32>
    %83 = arith.addf %82, %81 : vector<16x32xf32>
    %84 = arith.mulf %83, %83 : vector<16x32xf32>
    %cst_26 = arith.constant 1.000000e+00 : f32
    %85 = vector.broadcast %cst_26 : f32 to vector<16x32xf32>
    %86 = arith.subf %84, %85 : vector<16x32xf32>
    %cst_27 = arith.constant 1.000000e+00 : f32
    %87 = vector.broadcast %cst_27 : f32 to vector<16x32xf32>
    %88 = arith.addf %84, %87 : vector<16x32xf32>
    %89 = tpu.reciprocal %88 {approx = true} : vector<16x32xf32> -> vector<16x32xf32>
    %90 = arith.mulf %86, %89 : vector<16x32xf32>
    %91 = arith.mulf %78, %90 : vector<16x32xf32>
    %92 = arith.truncf %91 : vector<16x32xf32> to vector<16x32xbf16>
    %c0_28 = arith.constant 0 : index
    %c0_29 = arith.constant 0 : index
    %93 = vector.load %arg4[%c0_28, %c0_29] : memref<32x128xbf16, #tpu.memory_space<vmem>>, vector<32x128xbf16>
    %cst_30 = arith.constant dense<0.000000e+00> : vector<16x128xf32>
    %94 = tpu.matmul %92, %93, %cst_30 {dimension_numbers = #tpu.dot_dimension_numbers<[1], [0], [0], [1], [0, 0, 1, 1], [], []>} : vector<16x32xbf16>, vector<32x128xbf16>, vector<16x128xf32> -> vector<16x128xf32>
    %95 = vector.broadcast %8 : vector<1x128xf32> to vector<16x128xf32>
    %96 = arith.addf %94, %95 : vector<16x128xf32>
    %c0_31 = arith.constant 0 : index
    %c0_32 = arith.constant 0 : index
    %97 = vector.load %arg6[%c0_31, %c0_32] : memref<16x128xf32, #tpu.memory_space<vmem>>, vector<16x128xf32>
    tpu.vector_store %arg6[%c0_31, %c0_32], %96 {strides = array<i32>} : memref<16x128xf32, #tpu.memory_space<vmem>>, vector<16x128xf32>,
    return
  }
  func.func @transform_0(%arg0: i32) -> (i32, i32) {
    %c0_i32 = arith.constant 0 : i32
    %c0_i32_0 = arith.constant 0 : i32
    return %arg0, %c0_i32 : i32, i32
  }
  func.func @transform_1(%arg0: i32) -> (i32, i32) {
    %c0_i32 = arith.constant 0 : i32
    %c0_i32_0 = arith.constant 0 : i32
    %c0_i32_1 = arith.constant 0 : i32
    return %c0_i32, %c0_i32_0 : i32, i32
  }
  func.func @transform_2(%arg0: i32) -> (i32, i32) {
    %c0_i32 = arith.constant 0 : i32
    %c0_i32_0 = arith.constant 0 : i32
    %c0_i32_1 = arith.constant 0 : i32
    return %c0_i32, %c0_i32_0 : i32, i32
  }
  func.func @transform_3(%arg0: i32) -> (i32, i32) {
    %c0_i32 = arith.constant 0 : i32
    %c0_i32_0 = arith.constant 0 : i32
    %c0_i32_1 = arith.constant 0 : i32
    return %c0_i32, %c0_i32_0 : i32, i32
  }
  func.func @transform_4(%arg0: i32) -> (i32, i32) {
    %c0_i32 = arith.constant 0 : i32
    %c0_i32_0 = arith.constant 0 : i32
    %c0_i32_1 = arith.constant 0 : i32
    return %c0_i32, %c0_i32_0 : i32, i32
  }
  func.func @transform_5(%arg0: i32) -> (i32, i32) {
    %c0_i32 = arith.constant 0 : i32
    %c0_i32_0 = arith.constant 0 : i32
    return %arg0, %c0_i32 : i32, i32
  }
}

</mosaic_0001>

<bundles_post_ra>
// kernel: tpu_custom_call.1
= control target key start
LH: loop header
LB: loop body
LE: loop exit
PB: predicated region body
PF: predicated region fallthrough
CT: control target
= control target key end

     0   :  { %10 = vsyncpa [#allocation3], 0  ;;  %s1506_s0 = inlined_call_operand.hbm [shape: bf16[20,32], index: 0, kind: input, shape index: {}]   ;;  %s1507_s1 = inlined_call_operand.hbm [shape: bf16[32,32], index: 1, kind: input, shape index: {}]   ;;  %s1508_s2 = inlined_call_operand.hbm [shape: bf16[32,32], index: 2, kind: input, shape index: {}]   ;;  %s1509_s3 = inlined_call_operand.hbm [shape: bf16[32,128], index: 3, kind: input, shape index: {}]   ;;  %s1510_s4 = inlined_call_operand.hbm [shape: f32[8,128], index: 4, kind: input, shape index: {}]   ;;  %s1511_s5 = inlined_call_operand.hbm [shape: f32[20,128], index: 5, kind: output, shape index: {}]  }
   0x1   :  { %12 = vsyncpa [#allocation3 + $0x1], 0 }
   0x2   :  { %13 = vsyncpa [#allocation6], 0 }
   0x3   :  { %14 = vsyncpa [#allocation9], 0 }
   0x4   :  { %15 = vsyncpa [#allocation4], 0 }
   0x5   :  { %17 = vsyncpa [#allocation4 + $0x1], 0  ;;  %s1226_s18 = smov 0   ;;  %s1228_s19 = smov 0  }
   0x6   :  { %s1230_s20 = smov 0   ;;  %s1232_s21 = smov 0  }
   0x7 LB: > { %s1247_s22 = sadd.s32 4294967295, %s1180_s21   ;;  %s780_s23 = sadd.s32 4294967294, %s1180_s21   ;;  %s1180_s21 = sphi %s1232_s21, %s1530_s21   ;;  %s1176_s20 = sphi %s1230_s20, %s1529_s20   ;;  %s1172_s19 = sphi %s1228_s19, %s1528_s19   ;;  %s1168_s18 = sphi %s1226_s18, %s1527_s18  }
   0x8   : > { %s1251_s24 = sadd.s32 1, %s1180_s21   ;;  %s30_s25 = sadd.s32 1, %s1176_s20 }
   0x9   : > { %s27_s26 = ssub.s32 %s1180_s21, %s1251_s24  ;;  %p37_p0 = scmp.ne.s32.totalorder %s1176_s20, %s1172_s19 }
   0xa   : > { %p28_p1 = scmp.eq.s32.totalorder %s27_s26, 0  ;;  %p38_p2 = scmp.eq.s32.totalorder %s1180_s21, 0 }
   0xb   : > { %p43_p3 = scmp.ne.s32.totalorder %s1172_s19, %s1168_s18  ;;  %p1512_p4 = scmp.eq.s32.totalorder %s1247_s22, 0 }
   0xc   : > { %s1263_s27 = scalar_select %p28_p1, %s1176_s20, %s30_s25  }
   0xd   : > { %p1265_p5 = por %p38_p2, %p37_p0  ;;  %p1271_p6 = por %p1512_p4, %p43_p3 }
   0xe   : > { %p151_p7 = scmp.eq.s32.totalorder %s1247_s22, 1  ;;  %p157_p8 = scmp.eq.s32.totalorder %s780_s23, 1 }
   0xf   : > { %p781_p9 = scmp.ge.s32.totalorder %s1180_s21, 1  ;;  %p164_p10 = scmp.lt.s32.totalorder %s1180_s21, 3 }
  0x10   : > { %p1278_p11 = por %p151_p7, %p37_p0  ;;  %p1282_p12 = por %p157_p8, %p43_p3 }
  0x11   : > { %p1286_p13 = pnand %p781_p9, %p164_p10  ;;  %s1182_s8 = smov [#allocation5]  }
  0x12   : > { %s1516_s30 = scalar_select %p1278_p11, 1, 0 }
  0x13   : > { %s1517_s6 = scalar_select %p1282_p12, 1, 0 }
  0x14   : > { %p877_p1 = pneg %p1286_p13  ;;  %s176_s9 = sshll.u32 %s1182_s8, 4  ;;  %s177_s9 = int_to_ptr.vmem [resolvable:$true] %s176_s9 }
  0x15   : > { %s1183_s11 = smov [#allocation8]   ;;  %s989_s13 = scalar_lea.vmem %s177_s9, 256 }
  0x16   : > { %p1294_p2 = pnand %p877_p1, %p1512_p4  ;;  %s202_s12 = sshll.u32 %s1183_s11, 4  ;;  %s203_s12 = int_to_ptr.vmem [resolvable:$true] %s202_s12 }
  0x17   : > { %p990_p3 = scmp.ne.s32.totalorder %s177_s9, %s989_s13  ;;  %p997_p9 = scmp.lt.s32.totalorder %s177_s9, %s177_s9 }
  0x18   : > { %p980_p0 = pneg %p1294_p2  ;;  %p998_p10 = scmp.lt.s32.totalorder %s989_s13, %s989_s13 }
  0x1a   : > { %p992_p7 = pnand %p990_p3, %p980_p0  ;;  %p999_p12 = por %p998_p10, %p997_p9 }
  0x1c   : > { %p993_p8 = pneg %p992_p7 }
  0x1e   : > { %p1000_p1 = pnand %p999_p12, %p993_p8 }
  0x20   : > { %1003 = shalt.err (!%p1000_p1)
}
  0x21   : > { %s1184_s14 = smov 64   ;;  %s1185_s15 = smov 4  }
  0x22   : > { %880 = dma.hbm_to_vmem [thread:$0]  (!%p1294_p2), %s1507_s1, 256, %s177_s9, [#allocation6], %s1184_s14, %s1184_s14, %s1185_s15  }
  0x23   : > { %s1015_s23 = scalar_lea.vmem %s203_s12, 256  ;;  %p1023_p12 = scmp.lt.s32.totalorder %s203_s12, %s203_s12 }
  0x24   : > { %p1016_p3 = scmp.ne.s32.totalorder %s203_s12, %s1015_s23  ;;  %p1024_p8 = scmp.lt.s32.totalorder %s1015_s23, %s1015_s23 }
  0x26   : > { %p1018_p7 = pnand %p1016_p3, %p980_p0  ;;  %p1025_p10 = por %p1024_p8, %p1023_p12 }
  0x28   : > { %p1019_p9 = pneg %p1018_p7 }
  0x2a   : > { %p1026_p1 = pnand %p1025_p10, %p1019_p9 }
  0x2c   : > { %1029 = shalt.err (!%p1026_p1)
}
  0x2d   : > { %886 = dma.hbm_to_vmem [thread:$0]  (!%p1294_p2), %s1509_s3, 256, %s203_s12, [#allocation9], %s1184_s14, %s1184_s14, %s1185_s15  }
  0x2e   : > { %s1186_s8 = smov [#allocation7]   ;;  %s1187_s11 = smov [#allocation10]  }
  0x2f   : > { %s189_s9 = sshll.u32 %s1186_s8, 4  ;;  %s216_s13 = sshll.u32 %s1187_s11, 4  ;;  %s190_s9 = int_to_ptr.vmem [resolvable:$true] %s189_s9  ;;  %s217_s13 = int_to_ptr.vmem [resolvable:$true] %s216_s13 }
  0x30   : > { %s1041_s16 = scalar_lea.vmem %s190_s9, 256  ;;  %p1049_p12 = scmp.lt.s32.totalorder %s190_s9, %s190_s9 }
  0x31   : > { %p1042_p3 = scmp.ne.s32.totalorder %s190_s9, %s1041_s16  ;;  %p1050_p8 = scmp.lt.s32.totalorder %s1041_s16, %s1041_s16 }
  0x33   : > { %p1044_p7 = pnand %p1042_p3, %p980_p0  ;;  %p1051_p10 = por %p1050_p8, %p1049_p12 }
  0x35   : > { %p1045_p9 = pneg %p1044_p7 }
  0x37   : > { %p1052_p1 = pnand %p1051_p10, %p1045_p9 }
  0x39   : > { %1055 = shalt.err (!%p1052_p1)
}
  0x3a   : > { %883 = dma.hbm_to_vmem [thread:$0]  (!%p1294_p2), %s1508_s2, 256, %s190_s9, [#allocation6], %s1184_s14, %s1184_s14, %s1185_s15  }
  0x3b   : > { %s1067_s23 = scalar_lea.vmem %s217_s13, 128  ;;  %p1075_p12 = scmp.lt.s32.totalorder %s217_s13, %s217_s13 }
  0x3c   : > { %p1068_p4 = scmp.ne.s32.totalorder %s217_s13, %s1067_s23  ;;  %p1076_p9 = scmp.lt.s32.totalorder %s1067_s23, %s1067_s23 }
  0x3e   : > { %p1070_p3 = pnand %p1068_p4, %p980_p0  ;;  %p1077_p8 = por %p1076_p9, %p1075_p12 }
  0x40   : > { %p1071_p7 = pneg %p1070_p3 }
  0x42   : > { %p1078_p10 = pnand %p1077_p8, %p1071_p7 }
  0x44   : > { %1081 = shalt.err (!%p1078_p10)
}
  0x45   : > { %889 = dma.hbm_to_vmem [thread:$0]  (!%p1294_p2), %s1510_s4, 128, %s217_s13, [#allocation9]  }
  0x46   : > { %p1513_p1 = scmp.ge.s32.totalorder %s1180_s21, 2 }
  0x48   : > { %223 = sbr.rel (%p1513_p1) target bundleno = 109 (0x6d), region = 32 }
  0x4d   : > { %226 = sbr.rel (!%p1265_p5) target bundleno = 109 (0x6d), region = 36  ;;  %s227_s14 = sand.u32 (%p1265_p5), 1, %s1176_s20  }
  0x4e   : > { %s788_s15 = sshll.u32 (%p1265_p5), %s1180_s21, 1  ;;  %s787_s8 = sshll.u32 (%p1265_p5), %s227_s14, 3 }
  0x4f   : > { %s233_s9 = ssub.s32 (%p1265_p5), 3, %s788_s15  ;;  %s1351_s13 = scalar_lea.sflag (%p1265_p5), [#allocation3], %s227_s14 }
  0x50   : > { %p234_p4 = scmp.lt.s32.totalorder (%p1265_p5), %s233_s9, 2  ;;  %s231_s16 = scalar_lea.vmem (%p1265_p5), [#allocation2], %s787_s8 }
  0x52   : > { %s1532_s9 = smov (!%p234_p4, %s233_s9), 2 }
  0x53   : > { %s1348_s10 = sshll.u32 %s1532_s9, 6 }
  0x54   : > { %s238_s11 = ssub.s32 128, %s1348_s10 }
  0x55   : > { %239 = vsyncadd %s1351_s13, %s238_s11  ;;  %p790_p5 = scmp.ne.s32.totalorder %s1348_s10, 0  ;;  %s824_s28 = sshll.u32 %s1180_s21, 7 }
  0x56   : > { %s1359_s23 = scalar_lea.hbm %s1506_s0, %s824_s28  ;;  %s244_s25 = sshll.u32 %s231_s16, 4  ;;  %s1361_s25 = int_to_ptr.vmem [resolvable:$true] %s244_s25 }
  0x57   : > { %s1082_s26 = scalar_lea.hbm %s1359_s23, %s1348_s10  ;;  %s1086_s8 = scalar_lea.hbm %s1506_s0, 192 }
  0x58   : > { %p1083_p2 = scmp.ne.s32.totalorder %s1359_s23, %s1082_s26  ;;  %p1087_p7 = scmp.lt.s32.totalorder %s1359_s23, %s1506_s0 }
  0x59   : > { %p1088_p12 = scmp.lt.s32.totalorder %s1086_s8, %s1082_s26 }
  0x5a   : > { %p1084_p0 = pnand %p1083_p2, %p790_p5 }
  0x5b   : > { %p1089_p9 = por %p1088_p12, %p1087_p7 }
  0x5c   : > { %p1085_p3 = pneg %p1084_p0 }
  0x5e   : > { %p1090_p8 = pnand %p1089_p9, %p1085_p3 }
  0x60   : > { %1093 = shalt.err (!%p1090_p8)
}
  0x61   : > { %s1094_s16 = scalar_lea.vmem %s1361_s25, %s1348_s10  ;;  %s1188_s28 = smov [#allocation2]  }
  0x62   : > { %p1095_p10 = scmp.ne.s32.totalorder %s1361_s25, %s1094_s16  ;;  %s1098_s12 = sshll.u32 %s1188_s28, 4  ;;  %s1099_s12 = int_to_ptr.vmem [resolvable:$false] %s1098_s12 }
  0x63   : > { %s1100_s17 = scalar_lea.vmem %s1099_s12, 256  ;;  %p1101_p0 = scmp.lt.s32.totalorder %s1361_s25, %s1099_s12 }
  0x64   : > { %p1096_p4 = pnand %p1095_p10, %p790_p5  ;;  %p1102_p1 = scmp.lt.s32.totalorder %s1100_s17, %s1094_s16 }
  0x66   : > { %p1097_p2 = pneg %p1096_p4  ;;  %p1103_p11 = por %p1102_p1, %p1101_p0 }
  0x68   : > { %p1104_p7 = pnand %p1103_p11, %p1097_p2 }
  0x6a   : > { %1107 = shalt.err (!%p1104_p7)
}
  0x6b   : > { %s1189_s26 = smov 64   ;;  %s1190_s14 = smov 4  }
  0x6c   : > { %250 = dma.hbm_to_vmem [thread:$0]  (%p790_p5), %s1359_s23, %s1348_s10, %s1361_s25, %s1351_s13, %s1189_s26, %s1189_s26, %s1190_s14  }
  0x6d PF: > { %256 = sbr.rel (%p1286_p13) target bundleno = 1185 (0x4a1), region = 40  ;;  %s1390_s15 = sand.u32 (!%p1286_p13), 1, %s1172_s19  }
  0x6e   : > { %s795_s8 = sshll.u32 (!%p1286_p13), %s1390_s15, 3  ;;  %s259_s9 = scalar_lea.sflag (!%p1286_p13), [#allocation3], %s1390_s15 }
  0x6f   : > { %s262_s11 = scalar_lea.vmem (!%p1286_p13), [#allocation2], %s795_s8 }
  0x72   : > { %1151 = dma.done.wait (%p1271_p6), %s259_s9, 128  }
  0x73   : > { %1153 = vsyncadd (%p1271_p6), %s259_s9, 4294967168  ;;  %p1520_p11 = scmp.eq.s32.totalorder %s1247_s22, 0 }
  0x75   : > { %1155 = dma.done.wait (%p1520_p11), [#allocation6], 512   ;;  %p1521_p1 = pmov %p1520_p11 }
  0x77   : > { %1157 = vsyncadd (%p1521_p1), [#allocation6], 4294966784  ;;  %p1522_p13 = pmov %p1521_p1 }
  0x78   : > { %p1523_p5 = pmov %p1521_p1 }
  0x79   : > { %1159 = dma.done.wait (%p1522_p13), [#allocation9], 384  }
  0x7a   : > { %1161 = vsyncadd (%p1523_p5), [#allocation9], 4294966912  ;;  %v1191_v0 = vmov 0.0   ;;  %vm1192_vm0 = vmmov 0   ;;  %v947_v1 = vld [vmem:[#allocation5 + $0x8] sm:$0xff]   ;;  %v948_v2 = vld [vmem:[#allocation5] sm:$0xff]   ;;  %v323_v4 = vlaneseq }
  0x7b   : > { %835 = vmatprep.subr.bf16.mxu0 %v1191_v0  ;;  %839 = vmatprep.mubr.msk.bf16.mxu0 %vm1192_vm0, %v1191_v0  ;;  %v949_v3 = vld [vmem:[%s262_s11] sm:$0xff]   ;;  %vm344_vm1 = vcmask 261120   ;;  %s800_s29 = sshll.u32 %s1390_s15, 4  ;;  %s650_s10 = scalar_lea.sflag [#allocation4], %s1390_s15 }
  0x7c   : > { %843 = vmatprep.subr.bf16.mxu1 %v1191_v0  ;;  %847 = vmatprep.mubr.msk.bf16.mxu1 %vm1192_vm0, %v1191_v0  ;;  %v1414_v5 = vshrl.u32 %v323_v4, 7  ;;  %v1417_v7 = vld [vmem:[#allocation10] sm:$0xff]  ;;  %v950_v21 = vld [vmem:[#allocation7 + $0x8] sm:$0xff]   ;;  %s304_s7 = scalar_lea.vmem [#allocation11], %s800_s29  ;;  %p1524_p6 = scmp.ne.s32.totalorder %s1516_s30, 0 }
  0x7d   : > { %836 = vmatpush3.bf16.msra.mxu0 %v947_v1  ;;  %844 = vmatpush3.bf16.msra.mxu1 %v950_v21  ;;  %v951_v22 = vld [vmem:[#allocation7] sm:$0xff]   ;;  %s816_s13 = sshll.u32 (%p1524_p6), %s1247_s22, 1 }
  0x7e   : > { %837 = vmatprep.subr.bf16.mxu0 %v1191_v0  ;;  %v325_v6 = vsub.s32 0, %v1414_v5  ;;  %845 = vmatprep.subr.bf16.mxu1 %v1191_v0  ;;  %v423_v39 = vsub.s32 1, %v1414_v5  ;;  %v429_v40 = vsub.s32 2, %v1414_v5  ;;  %s658_s23 = ssub.s32 (%p1524_p6), 3, %s816_s13 }
  0x7f   : > { %p659_p3 = scmp.lt.s32.totalorder (%p1524_p6), %s658_s23, 2 }
  0x80   : > { %v326_v8 = vrot.slane %v1417_v7, %v325_v6  ;;  %v424_v42 = vrot.slane %v1417_v7, %v423_v39  ;;  %v430_v45 = vrot.slane %v1417_v7, %v429_v40 }
  0x81   : > { %838 = vmatpush3.bf16.msra.mxu0 %v948_v2  ;;  %846 = vmatpush3.bf16.msra.mxu1 %v951_v22 }
  0x82   : > { %851 = vmatprep.subr.bf16.mxu0 %v1191_v0 }
  0x84   : > { %840 = vmatmul.mubr.msk.bf16.vlgmr.msra.gmra.mxu0 %vm344_vm1, %v949_v3 }
  0x85   : > { %855 = vmatprep.mubr.msk.bf16.mxu0 %vm1192_vm0, %v1191_v0 }
 0x144   : > { %v382_v9 = vpop.f32.mrf.mxu0 }
 0x145   : > { %v383_v10 = vadd.f32 %v382_v9, %v326_v8 }
 0x146   : > { %v841_v11 = vpop.f32.mrf.mxu0 }
 0x147   : > { %v389_v12 = vsel %vm344_vm1, %v383_v10, 0.0  ;;  %v397_v13 = vmul.f32 %v383_v10, %v383_v10 }
 0x148   : > { %390 = vadd.xlane.f32.xlu0 %v389_v12  ;;  %v385_v14 = vpop.f32.mrf.mxu0 }
 0x149   : > { %v386_v15 = vadd.f32 %v385_v14, %v326_v8  ;;  %v399_v16 = vsel %vm344_vm1, %v397_v13, 0.0  ;;  %v460_v13 = vsub.s32 3, %v1414_v5 }
 0x14a   : > { %400 = vadd.xlane.f32.xlu1 %v399_v16  ;;  %v842_v17 = vpop.f32.mrf.mxu0 }
 0x14b   : > { %v392_v18 = vsel %vm344_vm1, %v386_v15, 0.0  ;;  %v398_v19 = vmul.f32 %v386_v15, %v386_v15  ;;  %v461_v14 = vrot.slane %v1417_v7, %v460_v13 }
 0x14c   : > { %393 = vadd.xlane.f32.xlu0 %v392_v18 }
 0x14d   : > { %v402_v20 = vsel %vm344_vm1, %v398_v19, 0.0 }
 0x14e   : > { %403 = vadd.xlane.f32.xlu1 %v402_v20 }
 0x1d1   : > { %v391_v23 = vpop.xlane.xlu0 %390 }
 0x1d2   : > { %v395_v24 = vmul.f32 0.03125, %v391_v23 }
 0x1d3   : > { %v401_v25 = vpop.xlane.xlu1 %400 }
 0x1d4   : > { %v407_v26 = vmul.f32 %v395_v24, %v395_v24  ;;  %v405_v27 = vmul.f32 0.03125, %v401_v25  ;;  %v413_v41 = vsub.f32 %v383_v10, %v395_v24 }
 0x1d5   : > { %v394_v28 = vpop.xlane.xlu0 %393 }
 0x1d6   : > { %v409_v29 = vsub.f32 %v405_v27, %v407_v26  ;;  %v396_v30 = vmul.f32 0.03125, %v394_v28  ;;  %v952_v27 = vld [vmem:[#allocation8 + $0x8] sm:$0xff]   ;;  %v953_v28 = vld [vmem:[#allocation8] sm:$0xff]  }
 0x1d7   : > { %v404_v31 = vpop.xlane.xlu1 %403  ;;  %852 = vmatpush3.bf16.msra.mxu0 %v952_v27 }
 0x1d8   : > { %v411_v32 = vmax.f32 %v409_v29, 0.0  ;;  %v408_v33 = vmul.f32 %v396_v30, %v396_v30  ;;  %v406_v34 = vmul.f32 0.03125, %v404_v31  ;;  %v414_v46 = vsub.f32 %v386_v15, %v396_v30  ;;  %853 = vmatprep.subr.bf16.mxu0 %v1191_v0 }
 0x1d9   : > { %v552_v0 = vsub.s32 4, %v1414_v5 }
 0x1da   : > { %v415_v35 = vadd.f32 1e-05, %v411_v32  ;;  %v410_v36 = vsub.f32 %v406_v34, %v408_v33 }
 0x1db   : > { %854 = vmatpush3.bf16.msra.mxu0 %v953_v28 }
 0x1dc   : > { %954 = vrsqrt.f32 %v415_v35  ;;  %v412_v37 = vmax.f32 %v410_v36, 0.0 }
 0x1de   : > { %v416_v38 = vadd.f32 1e-05, %v412_v37 }
 0x1e0   : > { %956 = vrsqrt.f32 %v416_v38 }
 0x1e9   : > { %v955_v43 = vpop.eup %954 }
 0x1ea   : > { %v419_v44 = vmul.f32 %v955_v43, %v413_v41 }
 0x1ec   : > { %v425_v47 = vmul.f32 %v424_v42, %v419_v44 }
 0x1ed   : > { %v957_v48 = vpop.eup %956 }
 0x1ee   : > { %v420_v49 = vmul.f32 %v957_v48, %v414_v46  ;;  %v431_v50 = vadd.f32 %v430_v45, %v425_v47  ;;  %v553_v47 = vrot.slane %v1417_v7, %v552_v0 }
 0x1f0   : > { %v426_v51 = vmul.f32 %v424_v42, %v420_v49  ;;  %v433_v52 = vmin.f32 %v431_v50, 20.0 }
 0x1f2   : > { %v432_v53 = vadd.f32 %v430_v45, %v426_v51  ;;  %v435_v54 = vmul.f32 1.442695, %v433_v52  ;;  %v558_v45 = vsub.s32 5, %v1414_v5 }
 0x1f4   : > { %v434_v55 = vmin.f32 %v432_v53, 20.0  ;;  %958 = vpow2.f32 %v435_v54 }
 0x1f6   : > { %v437_v56 = vmul.f32 1.442695, %v434_v55 }
 0x1f8   : > { %960 = vpow2.f32 %v437_v56 }
 0x201   : > { %v959_v57 = vpop.eup %958 }
 0x202   : > { %v439_v58 = vadd.f32 1.0, %v959_v57 }
 0x204   : > { %v441_v59 = vmul.f32 %v439_v58, %v439_v58 }
 0x205   : > { %v961_v60 = vpop.eup %960 }
 0x206   : > { %v440_v61 = vadd.f32 1.0, %v961_v60  ;;  %v445_v62 = vadd.f32 1.0, %v441_v59  ;;  %v805_v3 = vadd.f32 -1.0, %v441_v59 }
 0x208   : > { %v442_v63 = vmul.f32 %v440_v61, %v440_v61  ;;  %962 = vrcp.f32 %v445_v62 }
 0x20a   : > { %v446_v1 = vadd.f32 1.0, %v442_v63  ;;  %v806_v4 = vadd.f32 -1.0, %v442_v63 }
 0x20c   : > { %964 = vrcp.f32 %v446_v1 }
 0x215   : > { %v963_v2 = vpop.eup %962 }
 0x216   : > { %v449_v6 = vmul.f32 %v963_v2, %v805_v3 }
 0x218   : > { %v451_v10 = vmul.f32 %v449_v6, %v431_v50  ;;  %v559_v50 = vrot.slane %v1417_v7, %v558_v45 }
 0x219   : > { %v965_v8 = vpop.eup %964 }
 0x21a   : > { %v450_v9 = vmul.f32 %v965_v8, %v806_v4 }
 0x21c   : > { %v452_v11 = vmul.f32 %v450_v9, %v432_v53 }
 0x21e   : > { %v453_v12 = vpack.c.bf16 %v452_v11, %v451_v10 }
 0x220   : > { %848 = vmatmul.mubr.msk.bf16.vlgmr.msra.gmra.mxu1 %vm344_vm1, %v453_v12 }
 0x2e0   : > { %v511_v15 = vpop.f32.mrf.mxu1 }
 0x2e1   : > { %v512_v16 = vadd.f32 %v511_v15, %v461_v14 }
 0x2e2   : > { %v849_v17 = vpop.f32.mrf.mxu1 }
 0x2e3   : > { %v518_v18 = vsel %vm344_vm1, %v512_v16, 0.0  ;;  %v526_v19 = vmul.f32 %v512_v16, %v512_v16 }
 0x2e4   : > { %519 = vadd.xlane.f32.xlu0 %v518_v18  ;;  %v514_v20 = vpop.f32.mrf.mxu1  ;;  %v589_v18 = vsub.s32 6, %v1414_v5 }
 0x2e5   : > { %v515_v21 = vadd.f32 %v514_v20, %v461_v14  ;;  %v528_v23 = vsel %vm344_vm1, %v526_v19, 0.0 }
 0x2e6   : > { %v850_v22 = vpop.f32.mrf.mxu1  ;;  %v590_v19 = vrot.slane %v1417_v7, %v589_v18 }
 0x2e7   : > { %v521_v24 = vsel %vm344_vm1, %v515_v21, 0.0  ;;  %v527_v25 = vmul.f32 %v515_v21, %v515_v21 }
 0x2e8   : > { %529 = vadd.xlane.f32.xlu0 %v528_v23  ;;  %522 = vadd.xlane.f32.xlu1 %v521_v24 }
 0x2e9   : > { %v531_v26 = vsel %vm344_vm1, %v527_v25, 0.0 }
 0x2ec   : > { %532 = vadd.xlane.f32.xlu1 %v531_v26 }
 0x36d   : > { %v520_v29 = vpop.xlane.xlu0 %519 }
 0x36e   : > { %v524_v30 = vmul.f32 0.03125, %v520_v29 }
 0x370   : > { %v536_v33 = vmul.f32 %v524_v30, %v524_v30  ;;  %v542_v46 = vsub.f32 %v512_v16, %v524_v30 }
 0x371   : > { %v530_v31 = vpop.xlane.xlu0 %529  ;;  %v523_v32 = vpop.xlane.xlu1 %522 }
 0x372   : > { %v534_v34 = vmul.f32 0.03125, %v530_v31  ;;  %v525_v35 = vmul.f32 0.03125, %v523_v32 }
 0x374   : > { %v538_v36 = vsub.f32 %v534_v34, %v536_v33  ;;  %v537_v39 = vmul.f32 %v525_v35, %v525_v35  ;;  %v543_v51 = vsub.f32 %v515_v21, %v525_v35 }
 0x375   : > { %v533_v37 = vpop.xlane.xlu1 %532 }
 0x376   : > { %v540_v38 = vmax.f32 %v538_v36, 0.0  ;;  %v535_v40 = vmul.f32 0.03125, %v533_v37 }
 0x378   : > { %v544_v41 = vadd.f32 1e-05, %v540_v38  ;;  %v539_v42 = vsub.f32 %v535_v40, %v537_v39 }
 0x37a   : > { %966 = vrsqrt.f32 %v544_v41  ;;  %v541_v43 = vmax.f32 %v539_v42, 0.0 }
 0x37c   : > { %v545_v44 = vadd.f32 1e-05, %v541_v43 }
 0x37e   : > { %968 = vrsqrt.f32 %v545_v44 }
 0x387   : > { %v967_v48 = vpop.eup %966 }
 0x388   : > { %v548_v49 = vmul.f32 %v967_v48, %v542_v46 }
 0x38a   : > { %v554_v52 = vmul.f32 %v553_v47, %v548_v49 }
 0x38b   : > { %v969_v53 = vpop.eup %968 }
 0x38c   : > { %v549_v54 = vmul.f32 %v969_v53, %v543_v51  ;;  %v560_v55 = vadd.f32 %v559_v50, %v554_v52 }
 0x38e   : > { %v555_v56 = vmul.f32 %v553_v47, %v549_v54  ;;  %v562_v57 = vmin.f32 %v560_v55, 20.0 }
 0x390   : > { %v561_v58 = vadd.f32 %v559_v50, %v555_v56  ;;  %v564_v59 = vmul.f32 1.442695, %v562_v57 }
 0x392   : > { %v563_v60 = vmin.f32 %v561_v58, 20.0  ;;  %970 = vpow2.f32 %v564_v59 }
 0x394   : > { %v566_v61 = vmul.f32 1.442695, %v563_v60 }
 0x396   : > { %972 = vpow2.f32 %v566_v61 }
 0x39f   : > { %v971_v62 = vpop.eup %970 }
 0x3a0   : > { %v568_v63 = vadd.f32 1.0, %v971_v62 }
 0x3a2   : > { %v570_v1 = vmul.f32 %v568_v63, %v568_v63 }
 0x3a3   : > { %v973_v2 = vpop.eup %972 }
 0x3a4   : > { %v569_v3 = vadd.f32 1.0, %v973_v2  ;;  %v574_v4 = vadd.f32 1.0, %v570_v1  ;;  %v810_v10 = vadd.f32 -1.0, %v570_v1 }
 0x3a6   : > { %v571_v6 = vmul.f32 %v569_v3, %v569_v3  ;;  %974 = vrcp.f32 %v574_v4 }
 0x3a8   : > { %v575_v8 = vadd.f32 1.0, %v571_v6  ;;  %v811_v11 = vadd.f32 -1.0, %v571_v6 }
 0x3aa   : > { %976 = vrcp.f32 %v575_v8 }
 0x3b3   : > { %v975_v9 = vpop.eup %974 }
 0x3b4   : > { %v578_v12 = vmul.f32 %v975_v9, %v810_v10 }
 0x3b6   : > { %v580_v15 = vmul.f32 %v578_v12, %v560_v55 }
 0x3b7   : > { %v977_v13 = vpop.eup %976 }
 0x3b8   : > { %v579_v14 = vmul.f32 %v977_v13, %v811_v11 }
 0x3ba   : > { %v581_v16 = vmul.f32 %v579_v14, %v561_v58 }
 0x3bc   : > { %v582_v17 = vpack.c.bf16 %v581_v16, %v580_v15 }
 0x3be   : > { %856 = vmatmul.mubr.msk.bf16.vlgmr.msra.gmra.mxu0 %vm344_vm1, %v582_v17 }
 0x47e   : > { %v640_v20 = vpop.f32.mrf.mxu0 }
 0x47f   : > { %v641_v21 = vadd.f32 %v640_v20, %v590_v19 }
 0x480   : > { %v857_v22 = vpop.f32.mrf.mxu0 }
 0x481   : > { %647 = vst [vmem:[%s304_s7] sm:$0xff] %v641_v21  ;;  %656 = sbr.rel (!%p1524_p6) target bundleno = 1185 (0x4a1), region = 64 }
 0x482   : > { %v643_v23 = vpop.f32.mrf.mxu0 }
 0x483   : > { %v644_v24 = vadd.f32 %v643_v23, %v590_v19 }
 0x484   : > { %v858_v25 = vpop.f32.mrf.mxu0 }
 0x485   : > { %648 = vst [vmem:[%s304_s7 + $0x8] sm:$0xff] %v644_v24 }
 0x486   : > { %s1534_s23 = smov (!%p659_p3, %s658_s23), 2 }
 0x487   : > { %s1449_s25 = sshll.u32 %s1534_s23, 7 }
 0x488   : > { %s663_s16 = ssub.s32 256, %s1449_s25 }
 0x489   : > { %664 = vsyncadd %s650_s10, %s663_s16  ;;  %p818_p12 = scmp.ne.s32.totalorder %s1449_s25, 0  ;;  %s825_s28 = sshll.u32 %s1247_s22, 8 }
 0x48a   : > { %s1459_s17 = scalar_lea.hbm %s1511_s5, %s825_s28  ;;  %s669_s26 = sshll.u32 %s304_s7, 4  ;;  %s1461_s26 = int_to_ptr.vmem [resolvable:$true] %s669_s26 }
 0x48b   : > { %s1108_s14 = scalar_lea.vmem %s1461_s26, %s1449_s25  ;;  %s1193_s8 = smov [#allocation11]  }
 0x48c   : > { %p1109_p9 = scmp.ne.s32.totalorder %s1461_s26, %s1108_s14  ;;  %s1112_s9 = sshll.u32 %s1193_s8, 4  ;;  %s1113_s9 = int_to_ptr.vmem [resolvable:$false] %s1112_s9 }
 0x48d   : > { %s1114_s22 = scalar_lea.vmem %s1113_s9, 512  ;;  %p1115_p4 = scmp.lt.s32.totalorder %s1461_s26, %s1113_s9 }
 0x48e   : > { %p1110_p8 = pnand %p1109_p9, %p818_p12  ;;  %p1116_p2 = scmp.lt.s32.totalorder %s1114_s22, %s1108_s14 }
 0x490   : > { %p1111_p10 = pneg %p1110_p8  ;;  %p1117_p0 = por %p1116_p2, %p1115_p4 }
 0x492   : > { %p1118_p7 = pnand %p1117_p0, %p1111_p10 }
 0x494   : > { %1121 = shalt.err (!%p1118_p7)
}
 0x495   : > { %s1122_s11 = scalar_lea.hbm %s1459_s17, %s1449_s25  ;;  %s1126_s13 = scalar_lea.hbm %s1511_s5, 384 }
 0x496   : > { %p1123_p11 = scmp.ne.s32.totalorder %s1459_s17, %s1122_s11  ;;  %p1127_p5 = scmp.lt.s32.totalorder %s1459_s17, %s1511_s5 }
 0x497   : > { %p1128_p6 = scmp.lt.s32.totalorder %s1126_s13, %s1122_s11 }
 0x498   : > { %p1124_p1 = pnand %p1123_p11, %p818_p12 }
 0x499   : > { %p1129_p3 = por %p1128_p6, %p1127_p5 }
 0x49a   : > { %p1125_p13 = pneg %p1124_p1 }
 0x49c   : > { %p1130_p9 = pnand %p1129_p3, %p1125_p13 }
 0x49e   : > { %1133 = shalt.err (!%p1130_p9)
}
 0x49f   : > { %s1194_s28 = smov 128   ;;  %s1195_s30 = smov 8  }
 0x4a0   : > { %675 = dma.vmem_to_hbm [thread:$0]  (%p818_p12), %s1461_s26, %s1449_s25, %s1459_s17, %s650_s10, %s1194_s28, %s1194_s28, %s1195_s30  }
 0x4a1 PF: > { %s684_s12 = sand.u32 1, %s1168_s18   ;;  %p1525_p8 = scmp.ne.s32.totalorder %s1517_s6, 0 }
 0x4a2   : > { %p1526_p10 = scmp.ge.s32.totalorder %s1180_s21, 2  ;;  %s685_s14 = scalar_lea.sflag [#allocation4], %s684_s12 }
 0x4a4   : > { %p891_p4 = pnand %p1526_p10, %p1525_p8 }
 0x4a6   : > { %p892_p2 = pneg %p891_p4 }
 0x4a8   : > { %1163 = dma.done.wait (%p892_p2), %s685_s14, 256  }
 0x4a9   : > { %1165 = vsyncadd (%p892_p2), %s685_s14, 4294967040  ;;  %p20_p0 = scmp.ge.s32.totalorder %s1251_s24, 4   ;;  %s1527_s18 = smov %s1172_s19 }
 0x4aa   : > { %s1528_s19 = smov %s1176_s20  ;;  %s1529_s20 = smov %s1263_s27 }
 0x4ab   : > { %s1530_s21 = smov %s1251_s24  ;;  %22 = sbr.rel (!%p20_p0) target bundleno = 7 (0x7), region = 101 }
 0x4b0   :  { %690 = vsyncpa [#allocation3], 1 }
 0x4b1   :  { %692 = vsyncpa [#allocation3 + $0x1], 1 }
 0x4b2   :  { %693 = vsyncpa [#allocation6], 1 }
 0x4b3   :  { %694 = vsyncpa [#allocation9], 1 }
 0x4b4   :  { %695 = vsyncpa [#allocation4], 1 }
 0x4b5   :  { %697 = vsyncpa [#allocation4 + $0x1], 1 }

// kernel: tpu_custom_call.1
= control target key start
LH: loop header
LB: loop body
LE: loop exit
PB: predicated region body
PF: predicated region fallthrough
CT: control target
= control target key end

     0   :  { %10 = vsyncpa [#allocation3], 0  ;;  %s1506_s0 = inlined_call_operand.hbm [shape: bf16[20,32], index: 0, kind: input, shape index: {}]   ;;  %s1507_s1 = inlined_call_operand.hbm [shape: bf16[32,32], index: 1, kind: input, shape index: {}]   ;;  %s1508_s2 = inlined_call_operand.hbm [shape: bf16[32,32], index: 2, kind: input, shape index: {}]   ;;  %s1509_s3 = inlined_call_operand.hbm [shape: bf16[32,128], index: 3, kind: input, shape index: {}]   ;;  %s1510_s4 = inlined_call_operand.hbm [shape: f32[8,128], index: 4, kind: input, shape index: {}]   ;;  %s1511_s5 = inlined_call_operand.hbm [shape: f32[20,128], index: 5, kind: output, shape index: {}]  }
   0x1   :  { %12 = vsyncpa [#allocation3 + $0x1], 0 }
   0x2   :  { %13 = vsyncpa [#allocation6], 0 }
   0x3   :  { %14 = vsyncpa [#allocation9], 0 }
   0x4   :  { %15 = vsyncpa [#allocation4], 0 }
   0x5   :  { %17 = vsyncpa [#allocation4 + $0x1], 0  ;;  %s1226_s18 = smov 0   ;;  %s1228_s19 = smov 0  }
   0x6   :  { %s1230_s20 = smov 0   ;;  %s1232_s21 = smov 0  }
   0x7 LB: > { %s1247_s22 = sadd.s32 4294967295, %s1180_s21   ;;  %s780_s23 = sadd.s32 4294967294, %s1180_s21   ;;  %s1180_s21 = sphi %s1232_s21, %s1530_s21   ;;  %s1176_s20 = sphi %s1230_s20, %s1529_s20   ;;  %s1172_s19 = sphi %s1228_s19, %s1528_s19   ;;  %s1168_s18 = sphi %s1226_s18, %s1527_s18  }
   0x8   : > { %s1251_s24 = sadd.s32 1, %s1180_s21   ;;  %s30_s25 = sadd.s32 1, %s1176_s20 }
   0x9   : > { %s27_s26 = ssub.s32 %s1180_s21, %s1251_s24  ;;  %p37_p0 = scmp.ne.s32.totalorder %s1176_s20, %s1172_s19 }
   0xa   : > { %p28_p1 = scmp.eq.s32.totalorder %s27_s26, 0  ;;  %p38_p2 = scmp.eq.s32.totalorder %s1180_s21, 0 }
   0xb   : > { %p43_p3 = scmp.ne.s32.totalorder %s1172_s19, %s1168_s18  ;;  %p1512_p4 = scmp.eq.s32.totalorder %s1247_s22, 0 }
   0xc   : > { %s1263_s27 = scalar_select %p28_p1, %s1176_s20, %s30_s25  }
   0xd   : > { %p1265_p5 = por %p38_p2, %p37_p0  ;;  %p1271_p6 = por %p1512_p4, %p43_p3 }
   0xe   : > { %p151_p7 = scmp.eq.s32.totalorder %s1247_s22, 1  ;;  %p157_p8 = scmp.eq.s32.totalorder %s780_s23, 1 }
   0xf   : > { %p781_p9 = scmp.ge.s32.totalorder %s1180_s21, 1  ;;  %p164_p10 = scmp.lt.s32.totalorder %s1180_s21, 3 }
  0x10   : > { %p1278_p11 = por %p151_p7, %p37_p0  ;;  %p1282_p12 = por %p157_p8, %p43_p3 }
  0x11   : > { %p1286_p13 = pnand %p781_p9, %p164_p10  ;;  %s1182_s8 = smov [#allocation5]  }
  0x12   : > { %s1516_s30 = scalar_select %p1278_p11, 1, 0 }
  0x13   : > { %s1517_s6 = scalar_select %p1282_p12, 1, 0 }
  0x14   : > { %p877_p1 = pneg %p1286_p13  ;;  %s176_s9 = sshll.u32 %s1182_s8, 4  ;;  %s177_s9 = int_to_ptr.vmem [resolvable:$true] %s176_s9 }
  0x15   : > { %s1183_s11 = smov [#allocation8]   ;;  %s989_s13 = scalar_lea.vmem %s177_s9, 256 }
  0x16   : > { %p1294_p2 = pnand %p877_p1, %p1512_p4  ;;  %s202_s12 = sshll.u32 %s1183_s11, 4  ;;  %s203_s12 = int_to_ptr.vmem [resolvable:$true] %s202_s12 }
  0x17   : > { %p990_p3 = scmp.ne.s32.totalorder %s177_s9, %s989_s13  ;;  %p997_p9 = scmp.lt.s32.totalorder %s177_s9, %s177_s9 }
  0x18   : > { %p980_p0 = pneg %p1294_p2  ;;  %p998_p10 = scmp.lt.s32.totalorder %s989_s13, %s989_s13 }
  0x1a   : > { %p992_p7 = pnand %p990_p3, %p980_p0  ;;  %p999_p12 = por %p998_p10, %p997_p9 }
  0x1c   : > { %p993_p8 = pneg %p992_p7 }
  0x1e   : > { %p1000_p1 = pnand %p999_p12, %p993_p8 }
  0x20   : > { %1003 = shalt.err (!%p1000_p1)
}
  0x21   : > { %s1184_s14 = smov 64   ;;  %s1185_s15 = smov 4  }
  0x22   : > { %880 = dma.hbm_to_vmem [thread:$0]  (!%p1294_p2), %s1507_s1, 256, %s177_s9, [#allocation6], %s1184_s14, %s1184_s14, %s1185_s15  }
  0x23   : > { %s1015_s23 = scalar_lea.vmem %s203_s12, 256  ;;  %p1023_p12 = scmp.lt.s32.totalorder %s203_s12, %s203_s12 }
  0x24   : > { %p1016_p3 = scmp.ne.s32.totalorder %s203_s12, %s1015_s23  ;;  %p1024_p8 = scmp.lt.s32.totalorder %s1015_s23, %s1015_s23 }
  0x26   : > { %p1018_p7 = pnand %p1016_p3, %p980_p0  ;;  %p1025_p10 = por %p1024_p8, %p1023_p12 }
  0x28   : > { %p1019_p9 = pneg %p1018_p7 }
  0x2a   : > { %p1026_p1 = pnand %p1025_p10, %p1019_p9 }
  0x2c   : > { %1029 = shalt.err (!%p1026_p1)
}
  0x2d   : > { %886 = dma.hbm_to_vmem [thread:$0]  (!%p1294_p2), %s1509_s3, 256, %s203_s12, [#allocation9], %s1184_s14, %s1184_s14, %s1185_s15  }
  0x2e   : > { %s1186_s8 = smov [#allocation7]   ;;  %s1187_s11 = smov [#allocation10]  }
  0x2f   : > { %s189_s9 = sshll.u32 %s1186_s8, 4  ;;  %s216_s13 = sshll.u32 %s1187_s11, 4  ;;  %s190_s9 = int_to_ptr.vmem [resolvable:$true] %s189_s9  ;;  %s217_s13 = int_to_ptr.vmem [resolvable:$true] %s216_s13 }
  0x30   : > { %s1041_s16 = scalar_lea.vmem %s190_s9, 256  ;;  %p1049_p12 = scmp.lt.s32.totalorder %s190_s9, %s190_s9 }
  0x31   : > { %p1042_p3 = scmp.ne.s32.totalorder %s190_s9, %s1041_s16  ;;  %p1050_p8 = scmp.lt.s32.totalorder %s1041_s16, %s1041_s16 }
  0x33   : > { %p1044_p7 = pnand %p1042_p3, %p980_p0  ;;  %p1051_p10 = por %p1050_p8, %p1049_p12 }
  0x35   : > { %p1045_p9 = pneg %p1044_p7 }
  0x37   : > { %p1052_p1 = pnand %p1051_p10, %p1045_p9 }
  0x39   : > { %1055 = shalt.err (!%p1052_p1)
}
  0x3a   : > { %883 = dma.hbm_to_vmem [thread:$0]  (!%p1294_p2), %s1508_s2, 256, %s190_s9, [#allocation6], %s1184_s14, %s1184_s14, %s1185_s15  }
  0x3b   : > { %s1067_s23 = scalar_lea.vmem %s217_s13, 128  ;;  %p1075_p12 = scmp.lt.s32.totalorder %s217_s13, %s217_s13 }
  0x3c   : > { %p1068_p4 = scmp.ne.s32.totalorder %s217_s13, %s1067_s23  ;;  %p1076_p9 = scmp.lt.s32.totalorder %s1067_s23, %s1067_s23 }
  0x3e   : > { %p1070_p3 = pnand %p1068_p4, %p980_p0  ;;  %p1077_p8 = por %p1076_p9, %p1075_p12 }
  0x40   : > { %p1071_p7 = pneg %p1070_p3 }
  0x42   : > { %p1078_p10 = pnand %p1077_p8, %p1071_p7 }
  0x44   : > { %1081 = shalt.err (!%p1078_p10)
}
  0x45   : > { %889 = dma.hbm_to_vmem [thread:$0]  (!%p1294_p2), %s1510_s4, 128, %s217_s13, [#allocation9]  }
  0x46   : > { %p1513_p1 = scmp.ge.s32.totalorder %s1180_s21, 2 }
  0x48   : > { %223 = sbr.rel (%p1513_p1) target bundleno = 109 (0x6d), region = 32 }
  0x4d   : > { %226 = sbr.rel (!%p1265_p5) target bundleno = 109 (0x6d), region = 36  ;;  %s227_s14 = sand.u32 (%p1265_p5), 1, %s1176_s20  }
  0x4e   : > { %s788_s15 = sshll.u32 (%p1265_p5), %s1180_s21, 1  ;;  %s787_s8 = sshll.u32 (%p1265_p5), %s227_s14, 3 }
  0x4f   : > { %s233_s9 = ssub.s32 (%p1265_p5), 3, %s788_s15  ;;  %s1351_s13 = scalar_lea.sflag (%p1265_p5), [#allocation3], %s227_s14 }
  0x50   : > { %p234_p4 = scmp.lt.s32.totalorder (%p1265_p5), %s233_s9, 2  ;;  %s231_s16 = scalar_lea.vmem (%p1265_p5), [#allocation2], %s787_s8 }
  0x52   : > { %s1532_s9 = smov (!%p234_p4, %s233_s9), 2 }
  0x53   : > { %s1348_s10 = sshll.u32 %s1532_s9, 6 }
  0x54   : > { %s238_s11 = ssub.s32 128, %s1348_s10 }
  0x55   : > { %239 = vsyncadd %s1351_s13, %s238_s11  ;;  %p790_p5 = scmp.ne.s32.totalorder %s1348_s10, 0  ;;  %s824_s28 = sshll.u32 %s1180_s21, 7 }
  0x56   : > { %s1359_s23 = scalar_lea.hbm %s1506_s0, %s824_s28  ;;  %s244_s25 = sshll.u32 %s231_s16, 4  ;;  %s1361_s25 = int_to_ptr.vmem [resolvable:$true] %s244_s25 }
  0x57   : > { %s1082_s26 = scalar_lea.hbm %s1359_s23, %s1348_s10  ;;  %s1086_s8 = scalar_lea.hbm %s1506_s0, 192 }
  0x58   : > { %p1083_p2 = scmp.ne.s32.totalorder %s1359_s23, %s1082_s26  ;;  %p1087_p7 = scmp.lt.s32.totalorder %s1359_s23, %s1506_s0 }
  0x59   : > { %p1088_p12 = scmp.lt.s32.totalorder %s1086_s8, %s1082_s26 }
  0x5a   : > { %p1084_p0 = pnand %p1083_p2, %p790_p5 }
  0x5b   : > { %p1089_p9 = por %p1088_p12, %p1087_p7 }
  0x5c   : > { %p1085_p3 = pneg %p1084_p0 }
  0x5e   : > { %p1090_p8 = pnand %p1089_p9, %p1085_p3 }
  0x60   : > { %1093 = shalt.err (!%p1090_p8)
}
  0x61   : > { %s1094_s16 = scalar_lea.vmem %s1361_s25, %s1348_s10  ;;  %s1188_s28 = smov [#allocation2]  }
  0x62   : > { %p1095_p10 = scmp.ne.s32.totalorder %s1361_s25, %s1094_s16  ;;  %s1098_s12 = sshll.u32 %s1188_s28, 4  ;;  %s1099_s12 = int_to_ptr.vmem [resolvable:$false] %s1098_s12 }
  0x63   : > { %s1100_s17 = scalar_lea.vmem %s1099_s12, 256  ;;  %p1101_p0 = scmp.lt.s32.totalorder %s1361_s25, %s1099_s12 }
  0x64   : > { %p1096_p4 = pnand %p1095_p10, %p790_p5  ;;  %p1102_p1 = scmp.lt.s32.totalorder %s1100_s17, %s1094_s16 }
  0x66   : > { %p1097_p2 = pneg %p1096_p4  ;;  %p1103_p11 = por %p1102_p1, %p1101_p0 }
  0x68   : > { %p1104_p7 = pnand %p1103_p11, %p1097_p2 }
  0x6a   : > { %1107 = shalt.err (!%p1104_p7)
}
  0x6b   : > { %s1189_s26 = smov 64   ;;  %s1190_s14 = smov 4  }
  0x6c   : > { %250 = dma.hbm_to_vmem [thread:$0]  (%p790_p5), %s1359_s23, %s1348_s10, %s1361_s25, %s1351_s13, %s1189_s26, %s1189_s26, %s1190_s14  }
  0x6d PF: > { %256 = sbr.rel (%p1286_p13) target bundleno = 1185 (0x4a1), region = 40  ;;  %s1390_s15 = sand.u32 (!%p1286_p13), 1, %s1172_s19  }
  0x6e   : > { %s795_s8 = sshll.u32 (!%p1286_p13), %s1390_s15, 3  ;;  %s259_s9 = scalar_lea.sflag (!%p1286_p13), [#allocation3], %s1390_s15 }
  0x6f   : > { %s262_s11 = scalar_lea.vmem (!%p1286_p13), [#allocation2], %s795_s8 }
  0x72   : > { %1151 = dma.done.wait (%p1271_p6), %s259_s9, 128  }
  0x73   : > { %1153 = vsyncadd (%p1271_p6), %s259_s9, 4294967168  ;;  %p1520_p11 = scmp.eq.s32.totalorder %s1247_s22, 0 }
  0x75   : > { %1155 = dma.done.wait (%p1520_p11), [#allocation6], 512   ;;  %p1521_p1 = pmov %p1520_p11 }
  0x77   : > { %1157 = vsyncadd (%p1521_p1), [#allocation6], 4294966784  ;;  %p1522_p13 = pmov %p1521_p1 }
  0x78   : > { %p1523_p5 = pmov %p1521_p1 }
  0x79   : > { %1159 = dma.done.wait (%p1522_p13), [#allocation9], 384  }
  0x7a   : > { %1161 = vsyncadd (%p1523_p5), [#allocation9], 4294966912  ;;  %v1191_v0 = vmov 0.0   ;;  %vm1192_vm0 = vmmov 0   ;;  %v947_v1 = vld [vmem:[#allocation5 + $0x8] sm:$0xff]   ;;  %v948_v2 = vld [vmem:[#allocation5] sm:$0xff]   ;;  %v323_v4 = vlaneseq }
  0x7b   : > { %835 = vmatprep.subr.bf16.mxu0 %v1191_v0  ;;  %839 = vmatprep.mubr.msk.bf16.mxu0 %vm1192_vm0, %v1191_v0  ;;  %v949_v3 = vld [vmem:[%s262_s11] sm:$0xff]   ;;  %vm344_vm1 = vcmask 261120   ;;  %s800_s29 = sshll.u32 %s1390_s15, 4  ;;  %s650_s10 = scalar_lea.sflag [#allocation4], %s1390_s15 }
  0x7c   : > { %843 = vmatprep.subr.bf16.mxu1 %v1191_v0  ;;  %847 = vmatprep.mubr.msk.bf16.mxu1 %vm1192_vm0, %v1191_v0  ;;  %v1414_v5 = vshrl.u32 %v323_v4, 7  ;;  %v1417_v7 = vld [vmem:[#allocation10] sm:$0xff]  ;;  %v950_v21 = vld [vmem:[#allocation7 + $0x8] sm:$0xff]   ;;  %s304_s7 = scalar_lea.vmem [#allocation11], %s800_s29  ;;  %p1524_p6 = scmp.ne.s32.totalorder %s1516_s30, 0 }
  0x7d   : > { %836 = vmatpush3.bf16.msra.mxu0 %v947_v1  ;;  %844 = vmatpush3.bf16.msra.mxu1 %v950_v21  ;;  %v951_v22 = vld [vmem:[#allocation7] sm:$0xff]   ;;  %s816_s13 = sshll.u32 (%p1524_p6), %s1247_s22, 1 }
  0x7e   : > { %837 = vmatprep.subr.bf16.mxu0 %v1191_v0  ;;  %v325_v6 = vsub.s32 0, %v1414_v5  ;;  %845 = vmatprep.subr.bf16.mxu1 %v1191_v0  ;;  %v423_v39 = vsub.s32 1, %v1414_v5  ;;  %v429_v40 = vsub.s32 2, %v1414_v5  ;;  %s658_s23 = ssub.s32 (%p1524_p6), 3, %s816_s13 }
  0x7f   : > { %p659_p3 = scmp.lt.s32.totalorder (%p1524_p6), %s658_s23, 2 }
  0x80   : > { %v326_v8 = vrot.slane %v1417_v7, %v325_v6  ;;  %v424_v42 = vrot.slane %v1417_v7, %v423_v39  ;;  %v430_v45 = vrot.slane %v1417_v7, %v429_v40 }
  0x81   : > { %838 = vmatpush3.bf16.msra.mxu0 %v948_v2  ;;  %846 = vmatpush3.bf16.msra.mxu1 %v951_v22 }
  0x82   : > { %851 = vmatprep.subr.bf16.mxu0 %v1191_v0 }
  0x84   : > { %840 = vmatmul.mubr.msk.bf16.vlgmr.msra.gmra.mxu0 %vm344_vm1, %v949_v3 }
  0x85   : > { %855 = vmatprep.mubr.msk.bf16.mxu0 %vm1192_vm0, %v1191_v0 }
 0x144   : > { %v382_v9 = vpop.f32.mrf.mxu0 }
 0x145   : > { %v383_v10 = vadd.f32 %v382_v9, %v326_v8 }
 0x146   : > { %v841_v11 = vpop.f32.mrf.mxu0 }
 0x147   : > { %v389_v12 = vsel %vm344_vm1, %v383_v10, 0.0  ;;  %v397_v13 = vmul.f32 %v383_v10, %v383_v10 }
 0x148   : > { %390 = vadd.xlane.f32.xlu0 %v389_v12  ;;  %v385_v14 = vpop.f32.mrf.mxu0 }
 0x149   : > { %v386_v15 = vadd.f32 %v385_v14, %v326_v8  ;;  %v399_v16 = vsel %vm344_vm1, %v397_v13, 0.0  ;;  %v460_v13 = vsub.s32 3, %v1414_v5 }
 0x14a   : > { %400 = vadd.xlane.f32.xlu1 %v399_v16  ;;  %v842_v17 = vpop.f32.mrf.mxu0 }
 0x14b   : > { %v392_v18 = vsel %vm344_vm1, %v386_v15, 0.0  ;;  %v398_v19 = vmul.f32 %v386_v15, %v386_v15  ;;  %v461_v14 = vrot.slane %v1417_v7, %v460_v13 }
 0x14c   : > { %393 = vadd.xlane.f32.xlu0 %v392_v18 }
 0x14d   : > { %v402_v20 = vsel %vm344_vm1, %v398_v19, 0.0 }
 0x14e   : > { %403 = vadd.xlane.f32.xlu1 %v402_v20 }
 0x1d1   : > { %v391_v23 = vpop.xlane.xlu0 %390 }
 0x1d2   : > { %v395_v24 = vmul.f32 0.03125, %v391_v23 }
 0x1d3   : > { %v401_v25 = vpop.xlane.xlu1 %400 }
 0x1d4   : > { %v407_v26 = vmul.f32 %v395_v24, %v395_v24  ;;  %v405_v27 = vmul.f32 0.03125, %v401_v25  ;;  %v413_v41 = vsub.f32 %v383_v10, %v395_v24 }
 0x1d5   : > { %v394_v28 = vpop.xlane.xlu0 %393 }
 0x1d6   : > { %v409_v29 = vsub.f32 %v405_v27, %v407_v26  ;;  %v396_v30 = vmul.f32 0.03125, %v394_v28  ;;  %v952_v27 = vld [vmem:[#allocation8 + $0x8] sm:$0xff]   ;;  %v953_v28 = vld [vmem:[#allocation8] sm:$0xff]  }
 0x1d7   : > { %v404_v31 = vpop.xlane.xlu1 %403  ;;  %852 = vmatpush3.bf16.msra.mxu0 %v952_v27 }
 0x1d8   : > { %v411_v32 = vmax.f32 %v409_v29, 0.0  ;;  %v408_v33 = vmul.f32 %v396_v30, %v396_v30  ;;  %v406_v34 = vmul.f32 0.03125, %v404_v31  ;;  %v414_v46 = vsub.f32 %v386_v15, %v396_v30  ;;  %853 = vmatprep.subr.bf16.mxu0 %v1191_v0 }
 0x1d9   : > { %v552_v0 = vsub.s32 4, %v1414_v5 }
 0x1da   : > { %v415_v35 = vadd.f32 1e-05, %v411_v32  ;;  %v410_v36 = vsub.f32 %v406_v34, %v408_v33 }
 0x1db   : > { %854 = vmatpush3.bf16.msra.mxu0 %v953_v28 }
 0x1dc   : > { %954 = vrsqrt.f32 %v415_v35  ;;  %v412_v37 = vmax.f32 %v410_v36, 0.0 }
 0x1de   : > { %v416_v38 = vadd.f32 1e-05, %v412_v37 }
 0x1e0   : > { %956 = vrsqrt.f32 %v416_v38 }
 0x1e9   : > { %v955_v43 = vpop.eup %954 }
 0x1ea   : > { %v419_v44 = vmul.f32 %v955_v43, %v413_v41 }
 0x1ec   : > { %v425_v47 = vmul.f32 %v424_v42, %v419_v44 }
 0x1ed   : > { %v957_v48 = vpop.eup %956 }
 0x1ee   : > { %v420_v49 = vmul.f32 %v957_v48, %v414_v46  ;;  %v431_v50 = vadd.f32 %v430_v45, %v425_v47  ;;  %v553_v47 = vrot.slane %v1417_v7, %v552_v0 }
 0x1f0   : > { %v426_v51 = vmul.f32 %v424_v42, %v420_v49  ;;  %v433_v52 = vmin.f32 %v431_v50, 20.0 }
 0x1f2   : > { %v432_v53 = vadd.f32 %v430_v45, %v426_v51  ;;  %v435_v54 = vmul.f32 1.442695, %v433_v52  ;;  %v558_v45 = vsub.s32 5, %v1414_v5 }
 0x1f4   : > { %v434_v55 = vmin.f32 %v432_v53, 20.0  ;;  %958 = vpow2.f32 %v435_v54 }
 0x1f6   : > { %v437_v56 = vmul.f32 1.442695, %v434_v55 }
 0x1f8   : > { %960 = vpow2.f32 %v437_v56 }
 0x201   : > { %v959_v57 = vpop.eup %958 }
 0x202   : > { %v439_v58 = vadd.f32 1.0, %v959_v57 }
 0x204   : > { %v441_v59 = vmul.f32 %v439_v58, %v439_v58 }
 0x205   : > { %v961_v60 = vpop.eup %960 }
 0x206   : > { %v440_v61 = vadd.f32 1.0, %v961_v60  ;;  %v445_v62 = vadd.f32 1.0, %v441_v59  ;;  %v805_v3 = vadd.f32 -1.0, %v441_v59 }
 0x208   : > { %v442_v63 = vmul.f32 %v440_v61, %v440_v61  ;;  %962 = vrcp.f32 %v445_v62 }
 0x20a   : > { %v446_v1 = vadd.f32 1.0, %v442_v63  ;;  %v806_v4 = vadd.f32 -1.0, %v442_v63 }
 0x20c   : > { %964 = vrcp.f32 %v446_v1 }
 0x215   : > { %v963_v2 = vpop.eup %962 }
 0x216   : > { %v449_v6 = vmul.f32 %v963_v2, %v805_v3 }
 0x218   : > { %v451_v10 = vmul.f32 %v449_v6, %v431_v50  ;;  %v559_v50 = vrot.slane %v1417_v7, %v558_v45 }
 0x219   : > { %v965_v8 = vpop.eup %964 }
 0x21a   : > { %v450_v9 = vmul.f32 %v965_v8, %v806_v4 }
 0x21c   : > { %v452_v11 = vmul.f32 %v450_v9, %v432_v53 }
 0x21e   : > { %v453_v12 = vpack.c.bf16 %v452_v11, %v451_v10 }
 0x220   : > { %848 = vmatmul.mubr.msk.bf16.vlgmr.msra.gmra.mxu1 %vm344_vm1, %v453_v12 }
 0x2e0   : > { %v511_v15 = vpop.f32.mrf.mxu1 }
 0x2e1   : > { %v512_v16 = vadd.f32 %v511_v15, %v461_v14 }
 0x2e2   : > { %v849_v17 = vpop.f32.mrf.mxu1 }
 0x2e3   : > { %v518_v18 = vsel %vm344_vm1, %v512_v16, 0.0  ;;  %v526_v19 = vmul.f32 %v512_v16, %v512_v16 }
 0x2e4   : > { %519 = vadd.xlane.f32.xlu0 %v518_v18  ;;  %v514_v20 = vpop.f32.mrf.mxu1  ;;  %v589_v18 = vsub.s32 6, %v1414_v5 }
 0x2e5   : > { %v515_v21 = vadd.f32 %v514_v20, %v461_v14  ;;  %v528_v23 = vsel %vm344_vm1, %v526_v19, 0.0 }
 0x2e6   : > { %v850_v22 = vpop.f32.mrf.mxu1  ;;  %v590_v19 = vrot.slane %v1417_v7, %v589_v18 }
 0x2e7   : > { %v521_v24 = vsel %vm344_vm1, %v515_v21, 0.0  ;;  %v527_v25 = vmul.f32 %v515_v21, %v515_v21 }
 0x2e8   : > { %529 = vadd.xlane.f32.xlu0 %v528_v23  ;;  %522 = vadd.xlane.f32.xlu1 %v521_v24 }
 0x2e9   : > { %v531_v26 = vsel %vm344_vm1, %v527_v25, 0.0 }
 0x2ec   : > { %532 = vadd.xlane.f32.xlu1 %v531_v26 }
 0x36d   : > { %v520_v29 = vpop.xlane.xlu0 %519 }
 0x36e   : > { %v524_v30 = vmul.f32 0.03125, %v520_v29 }
 0x370   : > { %v536_v33 = vmul.f32 %v524_v30, %v524_v30  ;;  %v542_v46 = vsub.f32 %v512_v16, %v524_v30 }
 0x371   : > { %v530_v31 = vpop.xlane.xlu0 %529  ;;  %v523_v32 = vpop.xlane.xlu1 %522 }
 0x372   : > { %v534_v34 = vmul.f32 0.03125, %v530_v31  ;;  %v525_v35 = vmul.f32 0.03125, %v523_v32 }
 0x374   : > { %v538_v36 = vsub.f32 %v534_v34, %v536_v33  ;;  %v537_v39 = vmul.f32 %v525_v35, %v525_v35  ;;  %v543_v51 = vsub.f32 %v515_v21, %v525_v35 }
 0x375   : > { %v533_v37 = vpop.xlane.xlu1 %532 }
 0x376   : > { %v540_v38 = vmax.f32 %v538_v36, 0.0  ;;  %v535_v40 = vmul.f32 0.03125, %v533_v37 }
 0x378   : > { %v544_v41 = vadd.f32 1e-05, %v540_v38  ;;  %v539_v42 = vsub.f32 %v535_v40, %v537_v39 }
 0x37a   : > { %966 = vrsqrt.f32 %v544_v41  ;;  %v541_v43 = vmax.f32 %v539_v42, 0.0 }
 0x37c   : > { %v545_v44 = vadd.f32 1e-05, %v541_v43 }
 0x37e   : > { %968 = vrsqrt.f32 %v545_v44 }
 0x387   : > { %v967_v48 = vpop.eup %966 }
 0x388   : > { %v548_v49 = vmul.f32 %v967_v48, %v542_v46 }
 0x38a   : > { %v554_v52 = vmul.f32 %v553_v47, %v548_v49 }
 0x38b   : > { %v969_v53 = vpop.eup %968 }
 0x38c   : > { %v549_v54 = vmul.f32 %v969_v53, %v543_v51  ;;  %v560_v55 = vadd.f32 %v559_v50, %v554_v52 }
 0x38e   : > { %v555_v56 = vmul.f32 %v553_v47, %v549_v54  ;;  %v562_v57 = vmin.f32 %v560_v55, 20.0 }
 0x390   : > { %v561_v58 = vadd.f32 %v559_v50, %v555_v56  ;;  %v564_v59 = vmul.f32 1.442695, %v562_v57 }
 0x392   : > { %v563_v60 = vmin.f32 %v561_v58, 20.0  ;;  %970 = vpow2.f32 %v564_v59 }
 0x394   : > { %v566_v61 = vmul.f32 1.442695, %v563_v60 }
 0x396   : > { %972 = vpow2.f32 %v566_v61 }
 0x39f   : > { %v971_v62 = vpop.eup %970 }
 0x3a0   : > { %v568_v63 = vadd.f32 1.0, %v971_v62 }
 0x3a2   : > { %v570_v1 = vmul.f32 %v568_v63, %v568_v63 }
 0x3a3   : > { %v973_v2 = vpop.eup %972 }
 0x3a4   : > { %v569_v3 = vadd.f32 1.0, %v973_v2  ;;  %v574_v4 = vadd.f32 1.0, %v570_v1  ;;  %v810_v10 = vadd.f32 -1.0, %v570_v1 }
 0x3a6   : > { %v571_v6 = vmul.f32 %v569_v3, %v569_v3  ;;  %974 = vrcp.f32 %v574_v4 }
 0x3a8   : > { %v575_v8 = vadd.f32 1.0, %v571_v6  ;;  %v811_v11 = vadd.f32 -1.0, %v571_v6 }
 0x3aa   : > { %976 = vrcp.f32 %v575_v8 }
 0x3b3   : > { %v975_v9 = vpop.eup %974 }
 0x3b4   : > { %v578_v12 = vmul.f32 %v975_v9, %v810_v10 }
 0x3b6   : > { %v580_v15 = vmul.f32 %v578_v12, %v560_v55 }
 0x3b7   : > { %v977_v13 = vpop.eup %976 }
 0x3b8   : > { %v579_v14 = vmul.f32 %v977_v13, %v811_v11 }
 0x3ba   : > { %v581_v16 = vmul.f32 %v579_v14, %v561_v58 }
 0x3bc   : > { %v582_v17 = vpack.c.bf16 %v581_v16, %v580_v15 }
 0x3be   : > { %856 = vmatmul.mubr.msk.bf16.vlgmr.msra.gmra.mxu0 %vm344_vm1, %v582_v17 }
 0x47e   : > { %v640_v20 = vpop.f32.mrf.mxu0 }
 0x47f   : > { %v641_v21 = vadd.f32 %v640_v20, %v590_v19 }
 0x480   : > { %v857_v22 = vpop.f32.mrf.mxu0 }
 0x481   : > { %647 = vst [vmem:[%s304_s7] sm:$0xff] %v641_v21  ;;  %656 = sbr.rel (!%p1524_p6) target bundleno = 1185 (0x4a1), region = 64 }
 0x482   : > { %v643_v23 = vpop.f32.mrf.mxu0 }
 0x483   : > { %v644_v24 = vadd.f32 %v643_v23, %v590_v19 }
 0x484   : > { %v858_v25 = vpop.f32.mrf.mxu0 }
 0x485   : > { %648 = vst [vmem:[%s304_s7 + $0x8] sm:$0xff] %v644_v24 }
 0x486   : > { %s1534_s23 = smov (!%p659_p3, %s658_s23), 2 }
 0x487   : > { %s1449_s25 = sshll.u32 %s1534_s23, 7 }
 0x488   : > { %s663_s16 = ssub.s32 256, %s1449_s25 }
 0x489   : > { %664 = vsyncadd %s650_s10, %s663_s16  ;;  %p818_p12 = scmp.ne.s32.totalorder %s1449_s25, 0  ;;  %s825_s28 = sshll.u32 %s1247_s22, 8 }
 0x48a   : > { %s1459_s17 = scalar_lea.hbm %s1511_s5, %s825_s28  ;;  %s669_s26 = sshll.u32 %s304_s7, 4  ;;  %s1461_s26 = int_to_ptr.vmem [resolvable:$true] %s669_s26 }
 0x48b   : > { %s1108_s14 = scalar_lea.vmem %s1461_s26, %s1449_s25  ;;  %s1193_s8 = smov [#allocation11]  }
 0x48c   : > { %p1109_p9 = scmp.ne.s32.totalorder %s1461_s26, %s1108_s14  ;;  %s1112_s9 = sshll.u32 %s1193_s8, 4  ;;  %s1113_s9 = int_to_ptr.vmem [resolvable:$false] %s1112_s9 }
 0x48d   : > { %s1114_s22 = scalar_lea.vmem %s1113_s9, 512  ;;  %p1115_p4 = scmp.lt.s32.totalorder %s1461_s26, %s1113_s9 }
 0x48e   : > { %p1110_p8 = pnand %p1109_p9, %p818_p12  ;;  %p1116_p2 = scmp.lt.s32.totalorder %s1114_s22, %s1108_s14 }
 0x490   : > { %p1111_p10 = pneg %p1110_p8  ;;  %p1117_p0 = por %p1116_p2, %p1115_p4 }
 0x492   : > { %p1118_p7 = pnand %p1117_p0, %p1111_p10 }
 0x494   : > { %1121 = shalt.err (!%p1118_p7)
}
 0x495   : > { %s1122_s11 = scalar_lea.hbm %s1459_s17, %s1449_s25  ;;  %s1126_s13 = scalar_lea.hbm %s1511_s5, 384 }
 0x496   : > { %p1123_p11 = scmp.ne.s32.totalorder %s1459_s17, %s1122_s11  ;;  %p1127_p5 = scmp.lt.s32.totalorder %s1459_s17, %s1511_s5 }
 0x497   : > { %p1128_p6 = scmp.lt.s32.totalorder %s1126_s13, %s1122_s11 }
 0x498   : > { %p1124_p1 = pnand %p1123_p11, %p818_p12 }
 0x499   : > { %p1129_p3 = por %p1128_p6, %p1127_p5 }
 0x49a   : > { %p1125_p13 = pneg %p1124_p1 }
 0x49c   : > { %p1130_p9 = pnand %p1129_p3, %p1125_p13 }
 0x49e   : > { %1133 = shalt.err (!%p1130_p9)
}
 0x49f   : > { %s1194_s28 = smov 128   ;;  %s1195_s30 = smov 8  }
 0x4a0   : > { %675 = dma.vmem_to_hbm [thread:$0]  (%p818_p12), %s1461_s26, %s1449_s25, %s1459_s17, %s650_s10, %s1194_s28, %s1194_s28, %s1195_s30  }
 0x4a1 PF: > { %s684_s12 = sand.u32 1, %s1168_s18   ;;  %p1525_p8 = scmp.ne.s32.totalorder %s1517_s6, 0 }
 0x4a2   : > { %p1526_p10 = scmp.ge.s32.totalorder %s1180_s21, 2  ;;  %s685_s14 = scalar_lea.sflag [#allocation4], %s684_s12 }
 0x4a4   : > { %p891_p4 = pnand %p1526_p10, %p1525_p8 }
 0x4a6   : > { %p892_p2 = pneg %p891_p4 }
 0x4a8   : > { %1163 = dma.done.wait (%p892_p2), %s685_s14, 256  }
 0x4a9   : > { %1165 = vsyncadd (%p892_p2), %s685_s14, 4294967040  ;;  %p20_p0 = scmp.ge.s32.totalorder %s1251_s24, 4   ;;  %s1527_s18 = smov %s1172_s19 }
 0x4aa   : > { %s1528_s19 = smov %s1176_s20  ;;  %s1529_s20 = smov %s1263_s27 }
 0x4ab   : > { %s1530_s21 = smov %s1251_s24  ;;  %22 = sbr.rel (!%p20_p0) target bundleno = 7 (0x7), region = 101 }
 0x4b0   :  { %690 = vsyncpa [#allocation3], 1 }
 0x4b1   :  { %692 = vsyncpa [#allocation3 + $0x1], 1 }
 0x4b2   :  { %693 = vsyncpa [#allocation6], 1 }
 0x4b3   :  { %694 = vsyncpa [#allocation9], 1 }
 0x4b4   :  { %695 = vsyncpa [#allocation4], 1 }
 0x4b5   :  { %697 = vsyncpa [#allocation4 + $0x1], 1 }

</bundles_post_ra>
